<compile_context>
chip_gen: v7x
topology: tpu7x:2x2x1
jax: 0.10.0
libtpu: 0.0.40
codegen_flags: <defaults>
</compile_context>

<pallas_src>
import functools

import jax
import jax.numpy as jnp
import numpy as np
from jax.experimental import pallas as pl
from jax.experimental.pallas import tpu as pltpu


_VMEM = pl.BlockSpec(memory_space=pltpu.MemorySpace.VMEM)


# -----------------------------------------------------------------------------
# Fused Pallas kernel: GRU stack -> time-mean -> fc1 -> LayerNorm -> relu
#                      -> fc2 -> sigmoid
# -----------------------------------------------------------------------------
def _disc_kernel(*refs, num_layers, seq_len, batch, hidden):
    T, B, H = seq_len, batch, hidden

    # ---- unpack refs: inputs..., output, scratch ----
    x_ref = refs[0]                                   # (T*B, D0) time-major
    idx = 1
    layer_refs = []
    for _ in range(num_layers):
        # wih_t (Din, 3H), whh_t (H, 3H), gb (1, 3H), bhh_n (1, H)
        layer_refs.append(refs[idx:idx + 4])
        idx += 4
    w1_ref, b1_ref, gamma_ref, beta_ref, w2t_ref, b2_ref = refs[idx:idx + 6]
    idx += 6
    out_ref = refs[idx]                               # (B, 1)
    idx += 1
    act_a, act_b, gx_ref = refs[idx:idx + 3]          # VMEM scratch

    act_pingpong = (act_a, act_b)
    src = x_ref
    pooled = None

    for layer in range(num_layers):
        wih_ref, whh_ref, gb_ref, bhhn_ref = layer_refs[layer]
        is_last = layer == num_layers - 1

        # Hoisted input projection: ONE matmul over all timesteps and all
        # three gates; biases (b_ih, plus b_hh for r/z) folded in here.
        x2d = src[...]                                # (T*B, Din)
        gx_ref[...] = (
            jnp.dot(x2d, wih_ref[...], preferred_element_type=jnp.float32)
            + gb_ref[...]                             # (T*B, 3H)
        )

        whh = whh_ref[...]                            # (H, 3H), cols [r|z|n]
        bhh_n = bhhn_ref[...]                         # (1, H)
        dst = None if is_last else act_pingpong[layer % 2]

        h = jnp.zeros((B, H), jnp.float32)
        acc = jnp.zeros((B, H), jnp.float32)
        # T is small & static: fully unrolled recurrence so the scheduler can
        # overlap MXU / EUP / VPU work of adjacent steps.
        for t in range(T):
            lo = t * B
            gx = gx_ref[pl.ds(lo, B), :]              # (B, 3H)
            # Single recurrent matmul per step: all three gates at once.
            gh = jnp.dot(h, whh, preferred_element_type=jnp.float32)  # (B, 3H)
            # r and z share one fused sigmoid over a (B, 2H) slab.
            rz = jax.nn.sigmoid(gx[:, :2 * H] + gh[:, :2 * H])
            r = rz[:, :H]
            z = rz[:, H:]
            n = jnp.tanh(gx[:, 2 * H:]
                         + r * (gh[:, 2 * H:] + bhh_n))
            h = (1.0 - z) * n + z * h
            if is_last:
                acc = acc + h                         # in-loop time-mean accum
            else:
                dst[pl.ds(lo, B), :] = h              # VMEM-resident activations
        if is_last:
            pooled = acc * (1.0 / T)                  # (B, H)
        else:
            src = dst

    # ---- head: fc1 -> LayerNorm(eps=1e-5) -> relu -> fc2 -> sigmoid ----
    h1 = jnp.dot(pooled, w1_ref[...],
                 preferred_element_type=jnp.float32) + b1_ref[...]     # (B, 64)
    mu = jnp.mean(h1, axis=-1, keepdims=True)
    var = jnp.mean((h1 - mu) ** 2, axis=-1, keepdims=True)
    normed = (h1 - mu) * jax.lax.rsqrt(var + 1e-5)
    normed = normed * gamma_ref[...] + beta_ref[...]
    act = jnp.maximum(normed, 0.0)
    # fc2 has N=1: VPU multiply + lane reduction instead of an MXU matmul.
    logit = jnp.sum(act * w2t_ref[...], axis=-1, keepdims=True) + b2_ref[...]
    out_ref[...] = jax.nn.sigmoid(logit)


# -----------------------------------------------------------------------------
# Parameter init (PyTorch-equivalent shapes, gate order r, z, n)
# -----------------------------------------------------------------------------
def init_params(key, input_size, hidden_size, num_layers):
    params = {"gru": []}
    in_dim = input_size + 1                           # input + condition
    k = 1.0 / np.sqrt(hidden_size)
    for layer in range(num_layers):
        d = in_dim if layer == 0 else hidden_size
        key, k1, k2, k3, k4 = jax.random.split(key, 5)
        params["gru"].append(dict(
            # stored already transposed for x @ W, columns ordered [r | z | n]
            wih_t=jax.random.uniform(k1, (d, 3 * hidden_size), jnp.float32, -k, k),
            whh_t=jax.random.uniform(k2, (hidden_size, 3 * hidden_size),
                                     jnp.float32, -k, k),
            bih=jax.random.uniform(k3, (3 * hidden_size,), jnp.float32, -k, k),
            bhh=jax.random.uniform(k4, (3 * hidden_size,), jnp.float32, -k, k),
        ))
    key, k1, k2, k3, k4 = jax.random.split(key, 5)
    kf1 = 1.0 / np.sqrt(hidden_size)
    kf2 = 1.0 / np.sqrt(64.0)
    params["fc1_w"] = jax.random.uniform(k1, (hidden_size, 64), jnp.float32, -kf1, kf1)
    params["fc1_b"] = jax.random.uniform(k2, (64,), jnp.float32, -kf1, kf1)
    params["ln_gamma"] = jnp.ones((64,), jnp.float32)
    params["ln_beta"] = jnp.zeros((64,), jnp.float32)
    params["fc2_w"] = jax.random.uniform(k3, (64, 1), jnp.float32, -kf2, kf2)
    params["fc2_b"] = jax.random.uniform(k4, (1,), jnp.float32, -kf2, kf2)
    return params


# -----------------------------------------------------------------------------
# Wrapper (plain-JAX glue: layout prep + single pallas_call)
# -----------------------------------------------------------------------------
def _prep_layer_args(lp, H):
    bih, bhh = lp["bih"], lp["bhh"]
    # Fused biases: (b_ih + b_hh) for r/z, b_ih only for n.
    # b_hh_n stays separate: it must remain inside the r* factor.
    gb = jnp.concatenate([bih[:2 * H] + bhh[:2 * H], bih[2 * H:]])[None, :]  # (1,3H)
    bhhn = bhh[2 * H:][None, :]                                              # (1, H)
    return [lp["wih_t"], lp["whh_t"], gb, bhhn]


def discriminator_forward(params, inp, cond):
    """inp: (B, T, input_size), cond: (B, T, 1) -> (B,) in [0, 1]."""
    B, T, _ = inp.shape
    H = params["gru"][0]["whh_t"].shape[0]
    num_layers = len(params["gru"])

    # TODO(synk): inter-layer GRU dropout is a training-time op; this is the
    # eval-mode forward (dropout is a no-op).
    x = jnp.concatenate([inp, cond], axis=-1).astype(jnp.float32)      # (B,T,D)
    # time-major, flattened: row t*B + b  <->  (t, b)
    x2d = jnp.transpose(x, (1, 0, 2)).reshape(T * B, -1)

    args = [x2d]
    for lp in params["gru"]:
        args += _prep_layer_args(lp, H)
    args += [
        params["fc1_w"],                              # (H, 64)
        params["fc1_b"][None, :],                     # (1, 64)
        params["ln_gamma"][None, :],                  # (1, 64)
        params["ln_beta"][None, :],                   # (1, 64)
        params["fc2_w"].T,                            # (1, 64)
        params["fc2_b"][None, :],                     # (1, 1)
    ]

    kernel = functools.partial(_disc_kernel, num_layers=num_layers,
                               seq_len=T, batch=B, hidden=H)
    # VMEM scratch: ping-pong inter-layer activations + hoisted gate proj.
    scratch = [
        pltpu.VMEM((T * B, H), jnp.float32),          # activations (ping)
        pltpu.VMEM((T * B, H), jnp.float32),          # activations (pong)
        pltpu.VMEM((T * B, 3 * H), jnp.float32),      # hoisted x @ W_ih + bias
    ]
    # TODO(synk): for real (large-B) workloads add a batch-tiled grid with
    # dimension_semantics=("parallel",) so v7x's two TensorCores split the
    # batch and per-tile VMEM stays bounded; pointless at B=2 (< 8 sublanes).
    out = pl.pallas_call(
        kernel,
        out_shape=jax.ShapeDtypeStruct((B, 1), jnp.float32),
        in_specs=[_VMEM] * len(args),
        out_specs=_VMEM,
        scratch_shapes=scratch,
    )(*args)
    return out[:, 0]                                  # (B,)


# -----------------------------------------------------------------------------
# Pure-JAX reference (for correctness check)
# -----------------------------------------------------------------------------
def reference_forward(params, inp, cond):
    x = jnp.concatenate([inp, cond], axis=-1).astype(jnp.float32)      # (B,T,D)
    B, T, _ = x.shape
    h_seq = x
    for lp in params["gru"]:
        H = lp["whh_t"].shape[0]
        h = jnp.zeros((B, H), jnp.float32)
        outs = []
        for t in range(T):
            gx = h_seq[:, t, :] @ lp["wih_t"] + lp["bih"]
            gh = h @ lp["whh_t"] + lp["bhh"]
            r = jax.nn.sigmoid(gx[:, :H] + gh[:, :H])
            z = jax.nn.sigmoid(gx[:, H:2 * H] + gh[:, H:2 * H])
            n = jnp.tanh(gx[:, 2 * H:] + r * gh[:, 2 * H:])
            h = (1.0 - z) * n + z * h
            outs.append(h)
        h_seq = jnp.stack(outs, axis=1)               # (B, T, H)
    pooled = jnp.mean(h_seq, axis=1)
    h1 = pooled @ params["fc1_w"] + params["fc1_b"]
    mu = jnp.mean(h1, axis=-1, keepdims=True)
    var = jnp.mean((h1 - mu) ** 2, axis=-1, keepdims=True)
    normed = (h1 - mu) * jax.lax.rsqrt(var + 1e-5) * params["ln_gamma"] + params["ln_beta"]
    act = jnp.maximum(normed, 0.0)
    logit = act @ params["fc2_w"] + params["fc2_b"]
    return jax.nn.sigmoid(logit)[:, 0]


# -----------------------------------------------------------------------------
if __name__ == "__main__":
    batch, seq_len = 2, 8
    input_size, hidden_size, num_layers = 4, 32, 2

    key = jax.random.PRNGKey(0)
    pkey, ikey, ckey = jax.random.split(key, 3)

    params = init_params(pkey, input_size, hidden_size, num_layers)
    inp = jax.random.normal(ikey, (batch, seq_len, input_size), jnp.float32)
    cond = jax.random.normal(ckey, (batch, seq_len, 1), jnp.float32)

    out = jax.jit(discriminator_forward)(params, inp, cond)
    out = jax.block_until_ready(out)

    ref = reference_forward(params, inp, cond)
    np.testing.assert_allclose(np.asarray(out), np.asarray(ref),
                               rtol=1e-5, atol=1e-5)
    assert out.shape == (batch,)
    print("KERNEL_OK")
</pallas_src>

<mosaic_0001>
module attributes {stable_mosaic.version = 11 : i64} {
  func.func @_disc_kernel(%arg0: memref<16x5xf32, #tpu.memory_space<vmem>>, %arg1: memref<5x96xf32, #tpu.memory_space<vmem>>, %arg2: memref<32x96xf32, #tpu.memory_space<vmem>>, %arg3: memref<1x96xf32, #tpu.memory_space<vmem>>, %arg4: memref<1x32xf32, #tpu.memory_space<vmem>>, %arg5: memref<32x96xf32, #tpu.memory_space<vmem>>, %arg6: memref<32x96xf32, #tpu.memory_space<vmem>>, %arg7: memref<1x96xf32, #tpu.memory_space<vmem>>, %arg8: memref<1x32xf32, #tpu.memory_space<vmem>>, %arg9: memref<32x64xf32, #tpu.memory_space<vmem>>, %arg10: memref<1x64xf32, #tpu.memory_space<vmem>>, %arg11: memref<1x64xf32, #tpu.memory_space<vmem>>, %arg12: memref<1x64xf32, #tpu.memory_space<vmem>>, %arg13: memref<1x64xf32, #tpu.memory_space<vmem>>, %arg14: memref<1x1xf32, #tpu.memory_space<vmem>>, %arg15: memref<2x1xf32, #tpu.memory_space<vmem>>, %arg16: memref<16x32xf32, #tpu.memory_space<vmem>>, %arg17: memref<16x32xf32, #tpu.memory_space<vmem>>, %arg18: memref<16x96xf32, #tpu.memory_space<vmem>>) attributes {dimension_semantics = [], scalar_prefetch = 0 : i64, scratch_operands = 3 : i64, tpu.core_type = #tpu.core_type<tc>} {
    %c0 = arith.constant 0 : index
    %c0_0 = arith.constant 0 : index
    %0 = vector.load %arg0[%c0, %c0_0] : memref<16x5xf32, #tpu.memory_space<vmem>>, vector<16x5xf32>
    %c0_1 = arith.constant 0 : index
    %c0_2 = arith.constant 0 : index
    %1 = vector.load %arg1[%c0_1, %c0_2] : memref<5x96xf32, #tpu.memory_space<vmem>>, vector<5x96xf32>
    %cst = arith.constant dense<0.000000e+00> : vector<16x96xf32>
    %2 = tpu.matmul %0, %1, %cst {dimension_numbers = #tpu.dot_dimension_numbers<[1], [0], [0], [1], [0, 0, 1, 1], [], []>} : vector<16x5xf32>, vector<5x96xf32>, vector<16x96xf32> -> vector<16x96xf32>
    %c0_3 = arith.constant 0 : index
    %c0_4 = arith.constant 0 : index
    %3 = vector.load %arg3[%c0_3, %c0_4] : memref<1x96xf32, #tpu.memory_space<vmem>>, vector<1x96xf32>
    %4 = vector.broadcast %3 : vector<1x96xf32> to vector<16x96xf32>
    %5 = arith.addf %2, %4 : vector<16x96xf32>
    %c0_5 = arith.constant 0 : index
    %c0_6 = arith.constant 0 : index
    %6 = vector.load %arg18[%c0_5, %c0_6] : memref<16x96xf32, #tpu.memory_space<vmem>>, vector<16x96xf32>
    tpu.vector_store %arg18[%c0_5, %c0_6], %5 {strides = array<i32>} : memref<16x96xf32, #tpu.memory_space<vmem>>, vector<16x96xf32>,
    %c0_7 = arith.constant 0 : index
    %c0_8 = arith.constant 0 : index
    %7 = vector.load %arg2[%c0_7, %c0_8] : memref<32x96xf32, #tpu.memory_space<vmem>>, vector<32x96xf32>
    %c0_9 = arith.constant 0 : index
    %c0_10 = arith.constant 0 : index
    %8 = vector.load %arg4[%c0_9, %c0_10] : memref<1x32xf32, #tpu.memory_space<vmem>>, vector<1x32xf32>
    %cst_11 = arith.constant 0.000000e+00 : f32
    %9 = vector.broadcast %cst_11 : f32 to vector<2x32xf32>
    %c0_12 = arith.constant 0 : index
    %c0_13 = arith.constant 0 : index
    %10 = vector.load %arg18[%c0_12, %c0_13] : memref<16x96xf32, #tpu.memory_space<vmem>>, vector<2x96xf32>
    %cst_14 = arith.constant dense<0.000000e+00> : vector<2x96xf32>
    %11 = tpu.matmul %9, %7, %cst_14 {dimension_numbers = #tpu.dot_dimension_numbers<[1], [0], [0], [1], [0, 0, 1, 1], [], []>} : vector<2x32xf32>, vector<32x96xf32>, vector<2x96xf32> -> vector<2x96xf32>
    %12 = vector.extract_strided_slice %10 {offsets = [0, 0], sizes = [2, 64], strides = [1, 1]} : vector<2x96xf32> to vector<2x64xf32>
    %13 = vector.extract_strided_slice %11 {offsets = [0, 0], sizes = [2, 64], strides = [1, 1]} : vector<2x96xf32> to vector<2x64xf32>
    %14 = arith.addf %12, %13 : vector<2x64xf32>
    %15 = arith.negf %14 : vector<2x64xf32>
    %16 = math.exp %15 : vector<2x64xf32>
    %cst_15 = arith.constant 1.000000e+00 : f32
    %17 = vector.broadcast %cst_15 : f32 to vector<2x64xf32>
    %18 = arith.addf %17, %16 : vector<2x64xf32>
    %19 = arith.divf %17, %18 : vector<2x64xf32>
    %20 = vector.extract_strided_slice %19 {offsets = [0, 0], sizes = [2, 32], strides = [1, 1]} : vector<2x64xf32> to vector<2x32xf32>
    %21 = vector.extract_strided_slice %19 {offsets = [0, 32], sizes = [2, 32], strides = [1, 1]} : vector<2x64xf32> to vector<2x32xf32>
    %22 = vector.extract_strided_slice %10 {offsets = [0, 64], sizes = [2, 32], strides = [1, 1]} : vector<2x96xf32> to vector<2x32xf32>
    %23 = vector.extract_strided_slice %11 {offsets = [0, 64], sizes = [2, 32], strides = [1, 1]} : vector<2x96xf32> to vector<2x32xf32>
    %24 = vector.broadcast %8 : vector<1x32xf32> to vector<2x32xf32>
    %25 = arith.addf %23, %24 : vector<2x32xf32>
    %26 = arith.mulf %20, %25 : vector<2x32xf32>
    %27 = arith.addf %22, %26 : vector<2x32xf32>
    %28 = math.tanh %27 : vector<2x32xf32>
    %cst_16 = arith.constant 1.000000e+00 : f32
    %29 = vector.broadcast %cst_16 : f32 to vector<2x32xf32>
    %30 = arith.subf %29, %21 : vector<2x32xf32>
    %31 = arith.mulf %30, %28 : vector<2x32xf32>
    %32 = arith.mulf %21, %9 : vector<2x32xf32>
    %33 = arith.addf %31, %32 : vector<2x32xf32>
    %c0_17 = arith.constant 0 : index
    %c0_18 = arith.constant 0 : index
    %34 = vector.load %arg16[%c0_17, %c0_18] : memref<16x32xf32, #tpu.memory_space<vmem>>, vector<2x32xf32>
    tpu.vector_store %arg16[%c0_17, %c0_18], %33 {strides = array<i32>} : memref<16x32xf32, #tpu.memory_space<vmem>>, vector<2x32xf32>,
    %c2 = arith.constant 2 : index
    %c0_19 = arith.constant 0 : index
    %35 = vector.load %arg18[%c2, %c0_19] : memref<16x96xf32, #tpu.memory_space<vmem>>, vector<2x96xf32>
    %cst_20 = arith.constant dense<0.000000e+00> : vector<2x96xf32>
    %36 = tpu.matmul %33, %7, %cst_20 {dimension_numbers = #tpu.dot_dimension_numbers<[1], [0], [0], [1], [0, 0, 1, 1], [], []>} : vector<2x32xf32>, vector<32x96xf32>, vector<2x96xf32> -> vector<2x96xf32>
    %37 = vector.extract_strided_slice %35 {offsets = [0, 0], sizes = [2, 64], strides = [1, 1]} : vector<2x96xf32> to vector<2x64xf32>
    %38 = vector.extract_strided_slice %36 {offsets = [0, 0], sizes = [2, 64], strides = [1, 1]} : vector<2x96xf32> to vector<2x64xf32>
    %39 = arith.addf %37, %38 : vector<2x64xf32>
    %40 = arith.negf %39 : vector<2x64xf32>
    %41 = math.exp %40 : vector<2x64xf32>
    %cst_21 = arith.constant 1.000000e+00 : f32
    %42 = vector.broadcast %cst_21 : f32 to vector<2x64xf32>
    %43 = arith.addf %42, %41 : vector<2x64xf32>
    %44 = arith.divf %42, %43 : vector<2x64xf32>
    %45 = vector.extract_strided_slice %44 {offsets = [0, 0], sizes = [2, 32], strides = [1, 1]} : vector<2x64xf32> to vector<2x32xf32>
    %46 = vector.extract_strided_slice %44 {offsets = [0, 32], sizes = [2, 32], strides = [1, 1]} : vector<2x64xf32> to vector<2x32xf32>
    %47 = vector.extract_strided_slice %35 {offsets = [0, 64], sizes = [2, 32], strides = [1, 1]} : vector<2x96xf32> to vector<2x32xf32>
    %48 = vector.extract_strided_slice %36 {offsets = [0, 64], sizes = [2, 32], strides = [1, 1]} : vector<2x96xf32> to vector<2x32xf32>
    %49 = vector.broadcast %8 : vector<1x32xf32> to vector<2x32xf32>
    %50 = arith.addf %48, %49 : vector<2x32xf32>
    %51 = arith.mulf %45, %50 : vector<2x32xf32>
    %52 = arith.addf %47, %51 : vector<2x32xf32>
    %53 = math.tanh %52 : vector<2x32xf32>
    %cst_22 = arith.constant 1.000000e+00 : f32
    %54 = vector.broadcast %cst_22 : f32 to vector<2x32xf32>
    %55 = arith.subf %54, %46 : vector<2x32xf32>
    %56 = arith.mulf %55, %53 : vector<2x32xf32>
    %57 = arith.mulf %46, %33 : vector<2x32xf32>
    %58 = arith.addf %56, %57 : vector<2x32xf32>
    %c2_23 = arith.constant 2 : index
    %c0_24 = arith.constant 0 : index
    %59 = vector.load %arg16[%c2_23, %c0_24] : memref<16x32xf32, #tpu.memory_space<vmem>>, vector<2x32xf32>
    tpu.vector_store %arg16[%c2_23, %c0_24], %58 {strides = array<i32>} : memref<16x32xf32, #tpu.memory_space<vmem>>, vector<2x32xf32>,
    %c4 = arith.constant 4 : index
    %c0_25 = arith.constant 0 : index
    %60 = vector.load %arg18[%c4, %c0_25] : memref<16x96xf32, #tpu.memory_space<vmem>>, vector<2x96xf32>
    %cst_26 = arith.constant dense<0.000000e+00> : vector<2x96xf32>
    %61 = tpu.matmul %58, %7, %cst_26 {dimension_numbers = #tpu.dot_dimension_numbers<[1], [0], [0], [1], [0, 0, 1, 1], [], []>} : vector<2x32xf32>, vector<32x96xf32>, vector<2x96xf32> -> vector<2x96xf32>
    %62 = vector.extract_strided_slice %60 {offsets = [0, 0], sizes = [2, 64], strides = [1, 1]} : vector<2x96xf32> to vector<2x64xf32>
    %63 = vector.extract_strided_slice %61 {offsets = [0, 0], sizes = [2, 64], strides = [1, 1]} : vector<2x96xf32> to vector<2x64xf32>
    %64 = arith.addf %62, %63 : vector<2x64xf32>
    %65 = arith.negf %64 : vector<2x64xf32>
    %66 = math.exp %65 : vector<2x64xf32>
    %cst_27 = arith.constant 1.000000e+00 : f32
    %67 = vector.broadcast %cst_27 : f32 to vector<2x64xf32>
    %68 = arith.addf %67, %66 : vector<2x64xf32>
    %69 = arith.divf %67, %68 : vector<2x64xf32>
    %70 = vector.extract_strided_slice %69 {offsets = [0, 0], sizes = [2, 32], strides = [1, 1]} : vector<2x64xf32> to vector<2x32xf32>
    %71 = vector.extract_strided_slice %69 {offsets = [0, 32], sizes = [2, 32], strides = [1, 1]} : vector<2x64xf32> to vector<2x32xf32>
    %72 = vector.extract_strided_slice %60 {offsets = [0, 64], sizes = [2, 32], strides = [1, 1]} : vector<2x96xf32> to vector<2x32xf32>
    %73 = vector.extract_strided_slice %61 {offsets = [0, 64], sizes = [2, 32], strides = [1, 1]} : vector<2x96xf32> to vector<2x32xf32>
    %74 = vector.broadcast %8 : vector<1x32xf32> to vector<2x32xf32>
    %75 = arith.addf %73, %74 : vector<2x32xf32>
    %76 = arith.mulf %70, %75 : vector<2x32xf32>
    %77 = arith.addf %72, %76 : vector<2x32xf32>
    %78 = math.tanh %77 : vector<2x32xf32>
    %cst_28 = arith.constant 1.000000e+00 : f32
    %79 = vector.broadcast %cst_28 : f32 to vector<2x32xf32>
    %80 = arith.subf %79, %71 : vector<2x32xf32>
    %81 = arith.mulf %80, %78 : vector<2x32xf32>
    %82 = arith.mulf %71, %58 : vector<2x32xf32>
    %83 = arith.addf %81, %82 : vector<2x32xf32>
    %c4_29 = arith.constant 4 : index
    %c0_30 = arith.constant 0 : index
    %84 = vector.load %arg16[%c4_29, %c0_30] : memref<16x32xf32, #tpu.memory_space<vmem>>, vector<2x32xf32>
    tpu.vector_store %arg16[%c4_29, %c0_30], %83 {strides = array<i32>} : memref<16x32xf32, #tpu.memory_space<vmem>>, vector<2x32xf32>,
    %c6 = arith.constant 6 : index
    %c0_31 = arith.constant 0 : index
    %85 = vector.load %arg18[%c6, %c0_31] : memref<16x96xf32, #tpu.memory_space<vmem>>, vector<2x96xf32>
    %cst_32 = arith.constant dense<0.000000e+00> : vector<2x96xf32>
    %86 = tpu.matmul %83, %7, %cst_32 {dimension_numbers = #tpu.dot_dimension_numbers<[1], [0], [0], [1], [0, 0, 1, 1], [], []>} : vector<2x32xf32>, vector<32x96xf32>, vector<2x96xf32> -> vector<2x96xf32>
    %87 = vector.extract_strided_slice %85 {offsets = [0, 0], sizes = [2, 64], strides = [1, 1]} : vector<2x96xf32> to vector<2x64xf32>
    %88 = vector.extract_strided_slice %86 {offsets = [0, 0], sizes = [2, 64], strides = [1, 1]} : vector<2x96xf32> to vector<2x64xf32>
    %89 = arith.addf %87, %88 : vector<2x64xf32>
    %90 = arith.negf %89 : vector<2x64xf32>
    %91 = math.exp %90 : vector<2x64xf32>
    %cst_33 = arith.constant 1.000000e+00 : f32
    %92 = vector.broadcast %cst_33 : f32 to vector<2x64xf32>
    %93 = arith.addf %92, %91 : vector<2x64xf32>
    %94 = arith.divf %92, %93 : vector<2x64xf32>
    %95 = vector.extract_strided_slice %94 {offsets = [0, 0], sizes = [2, 32], strides = [1, 1]} : vector<2x64xf32> to vector<2x32xf32>
    %96 = vector.extract_strided_slice %94 {offsets = [0, 32], sizes = [2, 32], strides = [1, 1]} : vector<2x64xf32> to vector<2x32xf32>
    %97 = vector.extract_strided_slice %85 {offsets = [0, 64], sizes = [2, 32], strides = [1, 1]} : vector<2x96xf32> to vector<2x32xf32>
    %98 = vector.extract_strided_slice %86 {offsets = [0, 64], sizes = [2, 32], strides = [1, 1]} : vector<2x96xf32> to vector<2x32xf32>
    %99 = vector.broadcast %8 : vector<1x32xf32> to vector<2x32xf32>
    %100 = arith.addf %98, %99 : vector<2x32xf32>
    %101 = arith.mulf %95, %100 : vector<2x32xf32>
    %102 = arith.addf %97, %101 : vector<2x32xf32>
    %103 = math.tanh %102 : vector<2x32xf32>
    %cst_34 = arith.constant 1.000000e+00 : f32
    %104 = vector.broadcast %cst_34 : f32 to vector<2x32xf32>
    %105 = arith.subf %104, %96 : vector<2x32xf32>
    %106 = arith.mulf %105, %103 : vector<2x32xf32>
    %107 = arith.mulf %96, %83 : vector<2x32xf32>
    %108 = arith.addf %106, %107 : vector<2x32xf32>
    %c6_35 = arith.constant 6 : index
    %c0_36 = arith.constant 0 : index
    %109 = vector.load %arg16[%c6_35, %c0_36] : memref<16x32xf32, #tpu.memory_space<vmem>>, vector<2x32xf32>
    tpu.vector_store %arg16[%c6_35, %c0_36], %108 {strides = array<i32>} : memref<16x32xf32, #tpu.memory_space<vmem>>, vector<2x32xf32>,
    %c8 = arith.constant 8 : index
    %c0_37 = arith.constant 0 : index
    %110 = vector.load %arg18[%c8, %c0_37] : memref<16x96xf32, #tpu.memory_space<vmem>>, vector<2x96xf32>
    %cst_38 = arith.constant dense<0.000000e+00> : vector<2x96xf32>
    %111 = tpu.matmul %108, %7, %cst_38 {dimension_numbers = #tpu.dot_dimension_numbers<[1], [0], [0], [1], [0, 0, 1, 1], [], []>} : vector<2x32xf32>, vector<32x96xf32>, vector<2x96xf32> -> vector<2x96xf32>
    %112 = vector.extract_strided_slice %110 {offsets = [0, 0], sizes = [2, 64], strides = [1, 1]} : vector<2x96xf32> to vector<2x64xf32>
    %113 = vector.extract_strided_slice %111 {offsets = [0, 0], sizes = [2, 64], strides = [1, 1]} : vector<2x96xf32> to vector<2x64xf32>
    %114 = arith.addf %112, %113 : vector<2x64xf32>
    %115 = arith.negf %114 : vector<2x64xf32>
    %116 = math.exp %115 : vector<2x64xf32>
    %cst_39 = arith.constant 1.000000e+00 : f32
    %117 = vector.broadcast %cst_39 : f32 to vector<2x64xf32>
    %118 = arith.addf %117, %116 : vector<2x64xf32>
    %119 = arith.divf %117, %118 : vector<2x64xf32>
    %120 = vector.extract_strided_slice %119 {offsets = [0, 0], sizes = [2, 32], strides = [1, 1]} : vector<2x64xf32> to vector<2x32xf32>
    %121 = vector.extract_strided_slice %119 {offsets = [0, 32], sizes = [2, 32], strides = [1, 1]} : vector<2x64xf32> to vector<2x32xf32>
    %122 = vector.extract_strided_slice %110 {offsets = [0, 64], sizes = [2, 32], strides = [1, 1]} : vector<2x96xf32> to vector<2x32xf32>
    %123 = vector.extract_strided_slice %111 {offsets = [0, 64], sizes = [2, 32], strides = [1, 1]} : vector<2x96xf32> to vector<2x32xf32>
    %124 = vector.broadcast %8 : vector<1x32xf32> to vector<2x32xf32>
    %125 = arith.addf %123, %124 : vector<2x32xf32>
    %126 = arith.mulf %120, %125 : vector<2x32xf32>
    %127 = arith.addf %122, %126 : vector<2x32xf32>
    %128 = math.tanh %127 : vector<2x32xf32>
    %cst_40 = arith.constant 1.000000e+00 : f32
    %129 = vector.broadcast %cst_40 : f32 to vector<2x32xf32>
    %130 = arith.subf %129, %121 : vector<2x32xf32>
    %131 = arith.mulf %130, %128 : vector<2x32xf32>
    %132 = arith.mulf %121, %108 : vector<2x32xf32>
    %133 = arith.addf %131, %132 : vector<2x32xf32>
    %c8_41 = arith.constant 8 : index
    %c0_42 = arith.constant 0 : index
    %134 = vector.load %arg16[%c8_41, %c0_42] : memref<16x32xf32, #tpu.memory_space<vmem>>, vector<2x32xf32>
    tpu.vector_store %arg16[%c8_41, %c0_42], %133 {strides = array<i32>} : memref<16x32xf32, #tpu.memory_space<vmem>>, vector<2x32xf32>,
    %c10 = arith.constant 10 : index
    %c0_43 = arith.constant 0 : index
    %135 = vector.load %arg18[%c10, %c0_43] : memref<16x96xf32, #tpu.memory_space<vmem>>, vector<2x96xf32>
    %cst_44 = arith.constant dense<0.000000e+00> : vector<2x96xf32>
    %136 = tpu.matmul %133, %7, %cst_44 {dimension_numbers = #tpu.dot_dimension_numbers<[1], [0], [0], [1], [0, 0, 1, 1], [], []>} : vector<2x32xf32>, vector<32x96xf32>, vector<2x96xf32> -> vector<2x96xf32>
    %137 = vector.extract_strided_slice %135 {offsets = [0, 0], sizes = [2, 64], strides = [1, 1]} : vector<2x96xf32> to vector<2x64xf32>
    %138 = vector.extract_strided_slice %136 {offsets = [0, 0], sizes = [2, 64], strides = [1, 1]} : vector<2x96xf32> to vector<2x64xf32>
    %139 = arith.addf %137, %138 : vector<2x64xf32>
    %140 = arith.negf %139 : vector<2x64xf32>
    %141 = math.exp %140 : vector<2x64xf32>
    %cst_45 = arith.constant 1.000000e+00 : f32
    %142 = vector.broadcast %cst_45 : f32 to vector<2x64xf32>
    %143 = arith.addf %142, %141 : vector<2x64xf32>
    %144 = arith.divf %142, %143 : vector<2x64xf32>
    %145 = vector.extract_strided_slice %144 {offsets = [0, 0], sizes = [2, 32], strides = [1, 1]} : vector<2x64xf32> to vector<2x32xf32>
    %146 = vector.extract_strided_slice %144 {offsets = [0, 32], sizes = [2, 32], strides = [1, 1]} : vector<2x64xf32> to vector<2x32xf32>
    %147 = vector.extract_strided_slice %135 {offsets = [0, 64], sizes = [2, 32], strides = [1, 1]} : vector<2x96xf32> to vector<2x32xf32>
    %148 = vector.extract_strided_slice %136 {offsets = [0, 64], sizes = [2, 32], strides = [1, 1]} : vector<2x96xf32> to vector<2x32xf32>
    %149 = vector.broadcast %8 : vector<1x32xf32> to vector<2x32xf32>
    %150 = arith.addf %148, %149 : vector<2x32xf32>
    %151 = arith.mulf %145, %150 : vector<2x32xf32>
    %152 = arith.addf %147, %151 : vector<2x32xf32>
    %153 = math.tanh %152 : vector<2x32xf32>
    %cst_46 = arith.constant 1.000000e+00 : f32
    %154 = vector.broadcast %cst_46 : f32 to vector<2x32xf32>
    %155 = arith.subf %154, %146 : vector<2x32xf32>
    %156 = arith.mulf %155, %153 : vector<2x32xf32>
    %157 = arith.mulf %146, %133 : vector<2x32xf32>
    %158 = arith.addf %156, %157 : vector<2x32xf32>
    %c10_47 = arith.constant 10 : index
    %c0_48 = arith.constant 0 : index
    %159 = vector.load %arg16[%c10_47, %c0_48] : memref<16x32xf32, #tpu.memory_space<vmem>>, vector<2x32xf32>
    tpu.vector_store %arg16[%c10_47, %c0_48], %158 {strides = array<i32>} : memref<16x32xf32, #tpu.memory_space<vmem>>, vector<2x32xf32>,
    %c12 = arith.constant 12 : index
    %c0_49 = arith.constant 0 : index
    %160 = vector.load %arg18[%c12, %c0_49] : memref<16x96xf32, #tpu.memory_space<vmem>>, vector<2x96xf32>
    %cst_50 = arith.constant dense<0.000000e+00> : vector<2x96xf32>
    %161 = tpu.matmul %158, %7, %cst_50 {dimension_numbers = #tpu.dot_dimension_numbers<[1], [0], [0], [1], [0, 0, 1, 1], [], []>} : vector<2x32xf32>, vector<32x96xf32>, vector<2x96xf32> -> vector<2x96xf32>
    %162 = vector.extract_strided_slice %160 {offsets = [0, 0], sizes = [2, 64], strides = [1, 1]} : vector<2x96xf32> to vector<2x64xf32>
    %163 = vector.extract_strided_slice %161 {offsets = [0, 0], sizes = [2, 64], strides = [1, 1]} : vector<2x96xf32> to vector<2x64xf32>
    %164 = arith.addf %162, %163 : vector<2x64xf32>
    %165 = arith.negf %164 : vector<2x64xf32>
    %166 = math.exp %165 : vector<2x64xf32>
    %cst_51 = arith.constant 1.000000e+00 : f32
    %167 = vector.broadcast %cst_51 : f32 to vector<2x64xf32>
    %168 = arith.addf %167, %166 : vector<2x64xf32>
    %169 = arith.divf %167, %168 : vector<2x64xf32>
    %170 = vector.extract_strided_slice %169 {offsets = [0, 0], sizes = [2, 32], strides = [1, 1]} : vector<2x64xf32> to vector<2x32xf32>
    %171 = vector.extract_strided_slice %169 {offsets = [0, 32], sizes = [2, 32], strides = [1, 1]} : vector<2x64xf32> to vector<2x32xf32>
    %172 = vector.extract_strided_slice %160 {offsets = [0, 64], sizes = [2, 32], strides = [1, 1]} : vector<2x96xf32> to vector<2x32xf32>
    %173 = vector.extract_strided_slice %161 {offsets = [0, 64], sizes = [2, 32], strides = [1, 1]} : vector<2x96xf32> to vector<2x32xf32>
    %174 = vector.broadcast %8 : vector<1x32xf32> to vector<2x32xf32>
    %175 = arith.addf %173, %174 : vector<2x32xf32>
    %176 = arith.mulf %170, %175 : vector<2x32xf32>
    %177 = arith.addf %172, %176 : vector<2x32xf32>
    %178 = math.tanh %177 : vector<2x32xf32>
    %cst_52 = arith.constant 1.000000e+00 : f32
    %179 = vector.broadcast %cst_52 : f32 to vector<2x32xf32>
    %180 = arith.subf %179, %171 : vector<2x32xf32>
    %181 = arith.mulf %180, %178 : vector<2x32xf32>
    %182 = arith.mulf %171, %158 : vector<2x32xf32>
    %183 = arith.addf %181, %182 : vector<2x32xf32>
    %c12_53 = arith.constant 12 : index
    %c0_54 = arith.constant 0 : index
    %184 = vector.load %arg16[%c12_53, %c0_54] : memref<16x32xf32, #tpu.memory_space<vmem>>, vector<2x32xf32>
    tpu.vector_store %arg16[%c12_53, %c0_54], %183 {strides = array<i32>} : memref<16x32xf32, #tpu.memory_space<vmem>>, vector<2x32xf32>,
    %c14 = arith.constant 14 : index
    %c0_55 = arith.constant 0 : index
    %185 = vector.load %arg18[%c14, %c0_55] : memref<16x96xf32, #tpu.memory_space<vmem>>, vector<2x96xf32>
    %cst_56 = arith.constant dense<0.000000e+00> : vector<2x96xf32>
    %186 = tpu.matmul %183, %7, %cst_56 {dimension_numbers = #tpu.dot_dimension_numbers<[1], [0], [0], [1], [0, 0, 1, 1], [], []>} : vector<2x32xf32>, vector<32x96xf32>, vector<2x96xf32> -> vector<2x96xf32>
    %187 = vector.extract_strided_slice %185 {offsets = [0, 0], sizes = [2, 64], strides = [1, 1]} : vector<2x96xf32> to vector<2x64xf32>
    %188 = vector.extract_strided_slice %186 {offsets = [0, 0], sizes = [2, 64], strides = [1, 1]} : vector<2x96xf32> to vector<2x64xf32>
    %189 = arith.addf %187, %188 : vector<2x64xf32>
    %190 = arith.negf %189 : vector<2x64xf32>
    %191 = math.exp %190 : vector<2x64xf32>
    %cst_57 = arith.constant 1.000000e+00 : f32
    %192 = vector.broadcast %cst_57 : f32 to vector<2x64xf32>
    %193 = arith.addf %192, %191 : vector<2x64xf32>
    %194 = arith.divf %192, %193 : vector<2x64xf32>
    %195 = vector.extract_strided_slice %194 {offsets = [0, 0], sizes = [2, 32], strides = [1, 1]} : vector<2x64xf32> to vector<2x32xf32>
    %196 = vector.extract_strided_slice %194 {offsets = [0, 32], sizes = [2, 32], strides = [1, 1]} : vector<2x64xf32> to vector<2x32xf32>
    %197 = vector.extract_strided_slice %185 {offsets = [0, 64], sizes = [2, 32], strides = [1, 1]} : vector<2x96xf32> to vector<2x32xf32>
    %198 = vector.extract_strided_slice %186 {offsets = [0, 64], sizes = [2, 32], strides = [1, 1]} : vector<2x96xf32> to vector<2x32xf32>
    %199 = vector.broadcast %8 : vector<1x32xf32> to vector<2x32xf32>
    %200 = arith.addf %198, %199 : vector<2x32xf32>
    %201 = arith.mulf %195, %200 : vector<2x32xf32>
    %202 = arith.addf %197, %201 : vector<2x32xf32>
    %203 = math.tanh %202 : vector<2x32xf32>
    %cst_58 = arith.constant 1.000000e+00 : f32
    %204 = vector.broadcast %cst_58 : f32 to vector<2x32xf32>
    %205 = arith.subf %204, %196 : vector<2x32xf32>
    %206 = arith.mulf %205, %203 : vector<2x32xf32>
    %207 = arith.mulf %196, %183 : vector<2x32xf32>
    %208 = arith.addf %206, %207 : vector<2x32xf32>
    %c14_59 = arith.constant 14 : index
    %c0_60 = arith.constant 0 : index
    %209 = vector.load %arg16[%c14_59, %c0_60] : memref<16x32xf32, #tpu.memory_space<vmem>>, vector<2x32xf32>
    tpu.vector_store %arg16[%c14_59, %c0_60], %208 {strides = array<i32>} : memref<16x32xf32, #tpu.memory_space<vmem>>, vector<2x32xf32>,
    %c0_61 = arith.constant 0 : index
    %c0_62 = arith.constant 0 : index
    %210 = vector.load %arg16[%c0_61, %c0_62] : memref<16x32xf32, #tpu.memory_space<vmem>>, vector<16x32xf32>
    %c0_63 = arith.constant 0 : index
    %c0_64 = arith.constant 0 : index
    %211 = vector.load %arg5[%c0_63, %c0_64] : memref<32x96xf32, #tpu.memory_space<vmem>>, vector<32x96xf32>
    %cst_65 = arith.constant dense<0.000000e+00> : vector<16x96xf32>
    %212 = tpu.matmul %210, %211, %cst_65 {dimension_numbers = #tpu.dot_dimension_numbers<[1], [0], [0], [1], [0, 0, 1, 1], [], []>} : vector<16x32xf32>, vector<32x96xf32>, vector<16x96xf32> -> vector<16x96xf32>
    %c0_66 = arith.constant 0 : index
    %c0_67 = arith.constant 0 : index
    %213 = vector.load %arg7[%c0_66, %c0_67] : memref<1x96xf32, #tpu.memory_space<vmem>>, vector<1x96xf32>
    %214 = vector.broadcast %213 : vector<1x96xf32> to vector<16x96xf32>
    %215 = arith.addf %212, %214 : vector<16x96xf32>
    %c0_68 = arith.constant 0 : index
    %c0_69 = arith.constant 0 : index
    %216 = vector.load %arg18[%c0_68, %c0_69] : memref<16x96xf32, #tpu.memory_space<vmem>>, vector<16x96xf32>
    tpu.vector_store %arg18[%c0_68, %c0_69], %215 {strides = array<i32>} : memref<16x96xf32, #tpu.memory_space<vmem>>, vector<16x96xf32>,
    %c0_70 = arith.constant 0 : index
    %c0_71 = arith.constant 0 : index
    %217 = vector.load %arg6[%c0_70, %c0_71] : memref<32x96xf32, #tpu.memory_space<vmem>>, vector<32x96xf32>
    %c0_72 = arith.constant 0 : index
    %c0_73 = arith.constant 0 : index
    %218 = vector.load %arg8[%c0_72, %c0_73] : memref<1x32xf32, #tpu.memory_space<vmem>>, vector<1x32xf32>
    %cst_74 = arith.constant 0.000000e+00 : f32
    %219 = vector.broadcast %cst_74 : f32 to vector<2x32xf32>
    %cst_75 = arith.constant 0.000000e+00 : f32
    %220 = vector.broadcast %cst_75 : f32 to vector<2x32xf32>
    %c0_76 = arith.constant 0 : index
    %c0_77 = arith.constant 0 : index
    %221 = vector.load %arg18[%c0_76, %c0_77] : memref<16x96xf32, #tpu.memory_space<vmem>>, vector<2x96xf32>
    %cst_78 = arith.constant dense<0.000000e+00> : vector<2x96xf32>
    %222 = tpu.matmul %219, %217, %cst_78 {dimension_numbers = #tpu.dot_dimension_numbers<[1], [0], [0], [1], [0, 0, 1, 1], [], []>} : vector<2x32xf32>, vector<32x96xf32>, vector<2x96xf32> -> vector<2x96xf32>
    %223 = vector.extract_strided_slice %221 {offsets = [0, 0], sizes = [2, 64], strides = [1, 1]} : vector<2x96xf32> to vector<2x64xf32>
    %224 = vector.extract_strided_slice %222 {offsets = [0, 0], sizes = [2, 64], strides = [1, 1]} : vector<2x96xf32> to vector<2x64xf32>
    %225 = arith.addf %223, %224 : vector<2x64xf32>
    %226 = arith.negf %225 : vector<2x64xf32>
    %227 = math.exp %226 : vector<2x64xf32>
    %cst_79 = arith.constant 1.000000e+00 : f32
    %228 = vector.broadcast %cst_79 : f32 to vector<2x64xf32>
    %229 = arith.addf %228, %227 : vector<2x64xf32>
    %230 = arith.divf %228, %229 : vector<2x64xf32>
    %231 = vector.extract_strided_slice %230 {offsets = [0, 0], sizes = [2, 32], strides = [1, 1]} : vector<2x64xf32> to vector<2x32xf32>
    %232 = vector.extract_strided_slice %230 {offsets = [0, 32], sizes = [2, 32], strides = [1, 1]} : vector<2x64xf32> to vector<2x32xf32>
    %233 = vector.extract_strided_slice %221 {offsets = [0, 64], sizes = [2, 32], strides = [1, 1]} : vector<2x96xf32> to vector<2x32xf32>
    %234 = vector.extract_strided_slice %222 {offsets = [0, 64], sizes = [2, 32], strides = [1, 1]} : vector<2x96xf32> to vector<2x32xf32>
    %235 = vector.broadcast %218 : vector<1x32xf32> to vector<2x32xf32>
    %236 = arith.addf %234, %235 : vector<2x32xf32>
    %237 = arith.mulf %231, %236 : vector<2x32xf32>
    %238 = arith.addf %233, %237 : vector<2x32xf32>
    %239 = math.tanh %238 : vector<2x32xf32>
    %cst_80 = arith.constant 1.000000e+00 : f32
    %240 = vector.broadcast %cst_80 : f32 to vector<2x32xf32>
    %241 = arith.subf %240, %232 : vector<2x32xf32>
    %242 = arith.mulf %241, %239 : vector<2x32xf32>
    %243 = arith.mulf %232, %219 : vector<2x32xf32>
    %244 = arith.addf %242, %243 : vector<2x32xf32>
    %245 = arith.addf %220, %244 : vector<2x32xf32>
    %c2_81 = arith.constant 2 : index
    %c0_82 = arith.constant 0 : index
    %246 = vector.load %arg18[%c2_81, %c0_82] : memref<16x96xf32, #tpu.memory_space<vmem>>, vector<2x96xf32>
    %cst_83 = arith.constant dense<0.000000e+00> : vector<2x96xf32>
    %247 = tpu.matmul %244, %217, %cst_83 {dimension_numbers = #tpu.dot_dimension_numbers<[1], [0], [0], [1], [0, 0, 1, 1], [], []>} : vector<2x32xf32>, vector<32x96xf32>, vector<2x96xf32> -> vector<2x96xf32>
    %248 = vector.extract_strided_slice %246 {offsets = [0, 0], sizes = [2, 64], strides = [1, 1]} : vector<2x96xf32> to vector<2x64xf32>
    %249 = vector.extract_strided_slice %247 {offsets = [0, 0], sizes = [2, 64], strides = [1, 1]} : vector<2x96xf32> to vector<2x64xf32>
    %250 = arith.addf %248, %249 : vector<2x64xf32>
    %251 = arith.negf %250 : vector<2x64xf32>
    %252 = math.exp %251 : vector<2x64xf32>
    %cst_84 = arith.constant 1.000000e+00 : f32
    %253 = vector.broadcast %cst_84 : f32 to vector<2x64xf32>
    %254 = arith.addf %253, %252 : vector<2x64xf32>
    %255 = arith.divf %253, %254 : vector<2x64xf32>
    %256 = vector.extract_strided_slice %255 {offsets = [0, 0], sizes = [2, 32], strides = [1, 1]} : vector<2x64xf32> to vector<2x32xf32>
    %257 = vector.extract_strided_slice %255 {offsets = [0, 32], sizes = [2, 32], strides = [1, 1]} : vector<2x64xf32> to vector<2x32xf32>
    %258 = vector.extract_strided_slice %246 {offsets = [0, 64], sizes = [2, 32], strides = [1, 1]} : vector<2x96xf32> to vector<2x32xf32>
    %259 = vector.extract_strided_slice %247 {offsets = [0, 64], sizes = [2, 32], strides = [1, 1]} : vector<2x96xf32> to vector<2x32xf32>
    %260 = vector.broadcast %218 : vector<1x32xf32> to vector<2x32xf32>
    %261 = arith.addf %259, %260 : vector<2x32xf32>
    %262 = arith.mulf %256, %261 : vector<2x32xf32>
    %263 = arith.addf %258, %262 : vector<2x32xf32>
    %264 = math.tanh %263 : vector<2x32xf32>
    %cst_85 = arith.constant 1.000000e+00 : f32
    %265 = vector.broadcast %cst_85 : f32 to vector<2x32xf32>
    %266 = arith.subf %265, %257 : vector<2x32xf32>
    %267 = arith.mulf %266, %264 : vector<2x32xf32>
    %268 = arith.mulf %257, %244 : vector<2x32xf32>
    %269 = arith.addf %267, %268 : vector<2x32xf32>
    %270 = arith.addf %245, %269 : vector<2x32xf32>
    %c4_86 = arith.constant 4 : index
    %c0_87 = arith.constant 0 : index
    %271 = vector.load %arg18[%c4_86, %c0_87] : memref<16x96xf32, #tpu.memory_space<vmem>>, vector<2x96xf32>
    %cst_88 = arith.constant dense<0.000000e+00> : vector<2x96xf32>
    %272 = tpu.matmul %269, %217, %cst_88 {dimension_numbers = #tpu.dot_dimension_numbers<[1], [0], [0], [1], [0, 0, 1, 1], [], []>} : vector<2x32xf32>, vector<32x96xf32>, vector<2x96xf32> -> vector<2x96xf32>
    %273 = vector.extract_strided_slice %271 {offsets = [0, 0], sizes = [2, 64], strides = [1, 1]} : vector<2x96xf32> to vector<2x64xf32>
    %274 = vector.extract_strided_slice %272 {offsets = [0, 0], sizes = [2, 64], strides = [1, 1]} : vector<2x96xf32> to vector<2x64xf32>
    %275 = arith.addf %273, %274 : vector<2x64xf32>
    %276 = arith.negf %275 : vector<2x64xf32>
    %277 = math.exp %276 : vector<2x64xf32>
    %cst_89 = arith.constant 1.000000e+00 : f32
    %278 = vector.broadcast %cst_89 : f32 to vector<2x64xf32>
    %279 = arith.addf %278, %277 : vector<2x64xf32>
    %280 = arith.divf %278, %279 : vector<2x64xf32>
    %281 = vector.extract_strided_slice %280 {offsets = [0, 0], sizes = [2, 32], strides = [1, 1]} : vector<2x64xf32> to vector<2x32xf32>
    %282 = vector.extract_strided_slice %280 {offsets = [0, 32], sizes = [2, 32], strides = [1, 1]} : vector<2x64xf32> to vector<2x32xf32>
    %283 = vector.extract_strided_slice %271 {offsets = [0, 64], sizes = [2, 32], strides = [1, 1]} : vector<2x96xf32> to vector<2x32xf32>
    %284 = vector.extract_strided_slice %272 {offsets = [0, 64], sizes = [2, 32], strides = [1, 1]} : vector<2x96xf32> to vector<2x32xf32>
    %285 = vector.broadcast %218 : vector<1x32xf32> to vector<2x32xf32>
    %286 = arith.addf %284, %285 : vector<2x32xf32>
    %287 = arith.mulf %281, %286 : vector<2x32xf32>
    %288 = arith.addf %283, %287 : vector<2x32xf32>
    %289 = math.tanh %288 : vector<2x32xf32>
    %cst_90 = arith.constant 1.000000e+00 : f32
    %290 = vector.broadcast %cst_90 : f32 to vector<2x32xf32>
    %291 = arith.subf %290, %282 : vector<2x32xf32>
    %292 = arith.mulf %291, %289 : vector<2x32xf32>
    %293 = arith.mulf %282, %269 : vector<2x32xf32>
    %294 = arith.addf %292, %293 : vector<2x32xf32>
    %295 = arith.addf %270, %294 : vector<2x32xf32>
    %c6_91 = arith.constant 6 : index
    %c0_92 = arith.constant 0 : index
    %296 = vector.load %arg18[%c6_91, %c0_92] : memref<16x96xf32, #tpu.memory_space<vmem>>, vector<2x96xf32>
    %cst_93 = arith.constant dense<0.000000e+00> : vector<2x96xf32>
    %297 = tpu.matmul %294, %217, %cst_93 {dimension_numbers = #tpu.dot_dimension_numbers<[1], [0], [0], [1], [0, 0, 1, 1], [], []>} : vector<2x32xf32>, vector<32x96xf32>, vector<2x96xf32> -> vector<2x96xf32>
    %298 = vector.extract_strided_slice %296 {offsets = [0, 0], sizes = [2, 64], strides = [1, 1]} : vector<2x96xf32> to vector<2x64xf32>
    %299 = vector.extract_strided_slice %297 {offsets = [0, 0], sizes = [2, 64], strides = [1, 1]} : vector<2x96xf32> to vector<2x64xf32>
    %300 = arith.addf %298, %299 : vector<2x64xf32>
    %301 = arith.negf %300 : vector<2x64xf32>
    %302 = math.exp %301 : vector<2x64xf32>
    %cst_94 = arith.constant 1.000000e+00 : f32
    %303 = vector.broadcast %cst_94 : f32 to vector<2x64xf32>
    %304 = arith.addf %303, %302 : vector<2x64xf32>
    %305 = arith.divf %303, %304 : vector<2x64xf32>
    %306 = vector.extract_strided_slice %305 {offsets = [0, 0], sizes = [2, 32], strides = [1, 1]} : vector<2x64xf32> to vector<2x32xf32>
    %307 = vector.extract_strided_slice %305 {offsets = [0, 32], sizes = [2, 32], strides = [1, 1]} : vector<2x64xf32> to vector<2x32xf32>
    %308 = vector.extract_strided_slice %296 {offsets = [0, 64], sizes = [2, 32], strides = [1, 1]} : vector<2x96xf32> to vector<2x32xf32>
    %309 = vector.extract_strided_slice %297 {offsets = [0, 64], sizes = [2, 32], strides = [1, 1]} : vector<2x96xf32> to vector<2x32xf32>
    %310 = vector.broadcast %218 : vector<1x32xf32> to vector<2x32xf32>
    %311 = arith.addf %309, %310 : vector<2x32xf32>
    %312 = arith.mulf %306, %311 : vector<2x32xf32>
    %313 = arith.addf %308, %312 : vector<2x32xf32>
    %314 = math.tanh %313 : vector<2x32xf32>
    %cst_95 = arith.constant 1.000000e+00 : f32
    %315 = vector.broadcast %cst_95 : f32 to vector<2x32xf32>
    %316 = arith.subf %315, %307 : vector<2x32xf32>
    %317 = arith.mulf %316, %314 : vector<2x32xf32>
    %318 = arith.mulf %307, %294 : vector<2x32xf32>
    %319 = arith.addf %317, %318 : vector<2x32xf32>
    %320 = arith.addf %295, %319 : vector<2x32xf32>
    %c8_96 = arith.constant 8 : index
    %c0_97 = arith.constant 0 : index
    %321 = vector.load %arg18[%c8_96, %c0_97] : memref<16x96xf32, #tpu.memory_space<vmem>>, vector<2x96xf32>
    %cst_98 = arith.constant dense<0.000000e+00> : vector<2x96xf32>
    %322 = tpu.matmul %319, %217, %cst_98 {dimension_numbers = #tpu.dot_dimension_numbers<[1], [0], [0], [1], [0, 0, 1, 1], [], []>} : vector<2x32xf32>, vector<32x96xf32>, vector<2x96xf32> -> vector<2x96xf32>
    %323 = vector.extract_strided_slice %321 {offsets = [0, 0], sizes = [2, 64], strides = [1, 1]} : vector<2x96xf32> to vector<2x64xf32>
    %324 = vector.extract_strided_slice %322 {offsets = [0, 0], sizes = [2, 64], strides = [1, 1]} : vector<2x96xf32> to vector<2x64xf32>
    %325 = arith.addf %323, %324 : vector<2x64xf32>
    %326 = arith.negf %325 : vector<2x64xf32>
    %327 = math.exp %326 : vector<2x64xf32>
    %cst_99 = arith.constant 1.000000e+00 : f32
    %328 = vector.broadcast %cst_99 : f32 to vector<2x64xf32>
    %329 = arith.addf %328, %327 : vector<2x64xf32>
    %330 = arith.divf %328, %329 : vector<2x64xf32>
    %331 = vector.extract_strided_slice %330 {offsets = [0, 0], sizes = [2, 32], strides = [1, 1]} : vector<2x64xf32> to vector<2x32xf32>
    %332 = vector.extract_strided_slice %330 {offsets = [0, 32], sizes = [2, 32], strides = [1, 1]} : vector<2x64xf32> to vector<2x32xf32>
    %333 = vector.extract_strided_slice %321 {offsets = [0, 64], sizes = [2, 32], strides = [1, 1]} : vector<2x96xf32> to vector<2x32xf32>
    %334 = vector.extract_strided_slice %322 {offsets = [0, 64], sizes = [2, 32], strides = [1, 1]} : vector<2x96xf32> to vector<2x32xf32>
    %335 = vector.broadcast %218 : vector<1x32xf32> to vector<2x32xf32>
    %336 = arith.addf %334, %335 : vector<2x32xf32>
    %337 = arith.mulf %331, %336 : vector<2x32xf32>
    %338 = arith.addf %333, %337 : vector<2x32xf32>
    %339 = math.tanh %338 : vector<2x32xf32>
    %cst_100 = arith.constant 1.000000e+00 : f32
    %340 = vector.broadcast %cst_100 : f32 to vector<2x32xf32>
    %341 = arith.subf %340, %332 : vector<2x32xf32>
    %342 = arith.mulf %341, %339 : vector<2x32xf32>
    %343 = arith.mulf %332, %319 : vector<2x32xf32>
    %344 = arith.addf %342, %343 : vector<2x32xf32>
    %345 = arith.addf %320, %344 : vector<2x32xf32>
    %c10_101 = arith.constant 10 : index
    %c0_102 = arith.constant 0 : index
    %346 = vector.load %arg18[%c10_101, %c0_102] : memref<16x96xf32, #tpu.memory_space<vmem>>, vector<2x96xf32>
    %cst_103 = arith.constant dense<0.000000e+00> : vector<2x96xf32>
    %347 = tpu.matmul %344, %217, %cst_103 {dimension_numbers = #tpu.dot_dimension_numbers<[1], [0], [0], [1], [0, 0, 1, 1], [], []>} : vector<2x32xf32>, vector<32x96xf32>, vector<2x96xf32> -> vector<2x96xf32>
    %348 = vector.extract_strided_slice %346 {offsets = [0, 0], sizes = [2, 64], strides = [1, 1]} : vector<2x96xf32> to vector<2x64xf32>
    %349 = vector.extract_strided_slice %347 {offsets = [0, 0], sizes = [2, 64], strides = [1, 1]} : vector<2x96xf32> to vector<2x64xf32>
    %350 = arith.addf %348, %349 : vector<2x64xf32>
    %351 = arith.negf %350 : vector<2x64xf32>
    %352 = math.exp %351 : vector<2x64xf32>
    %cst_104 = arith.constant 1.000000e+00 : f32
    %353 = vector.broadcast %cst_104 : f32 to vector<2x64xf32>
    %354 = arith.addf %353, %352 : vector<2x64xf32>
    %355 = arith.divf %353, %354 : vector<2x64xf32>
    %356 = vector.extract_strided_slice %355 {offsets = [0, 0], sizes = [2, 32], strides = [1, 1]} : vector<2x64xf32> to vector<2x32xf32>
    %357 = vector.extract_strided_slice %355 {offsets = [0, 32], sizes = [2, 32], strides = [1, 1]} : vector<2x64xf32> to vector<2x32xf32>
    %358 = vector.extract_strided_slice %346 {offsets = [0, 64], sizes = [2, 32], strides = [1, 1]} : vector<2x96xf32> to vector<2x32xf32>
    %359 = vector.extract_strided_slice %347 {offsets = [0, 64], sizes = [2, 32], strides = [1, 1]} : vector<2x96xf32> to vector<2x32xf32>
    %360 = vector.broadcast %218 : vector<1x32xf32> to vector<2x32xf32>
    %361 = arith.addf %359, %360 : vector<2x32xf32>
    %362 = arith.mulf %356, %361 : vector<2x32xf32>
    %363 = arith.addf %358, %362 : vector<2x32xf32>
    %364 = math.tanh %363 : vector<2x32xf32>
    %cst_105 = arith.constant 1.000000e+00 : f32
    %365 = vector.broadcast %cst_105 : f32 to vector<2x32xf32>
    %366 = arith.subf %365, %357 : vector<2x32xf32>
    %367 = arith.mulf %366, %364 : vector<2x32xf32>
    %368 = arith.mulf %357, %344 : vector<2x32xf32>
    %369 = arith.addf %367, %368 : vector<2x32xf32>
    %370 = arith.addf %345, %369 : vector<2x32xf32>
    %c12_106 = arith.constant 12 : index
    %c0_107 = arith.constant 0 : index
    %371 = vector.load %arg18[%c12_106, %c0_107] : memref<16x96xf32, #tpu.memory_space<vmem>>, vector<2x96xf32>
    %cst_108 = arith.constant dense<0.000000e+00> : vector<2x96xf32>
    %372 = tpu.matmul %369, %217, %cst_108 {dimension_numbers = #tpu.dot_dimension_numbers<[1], [0], [0], [1], [0, 0, 1, 1], [], []>} : vector<2x32xf32>, vector<32x96xf32>, vector<2x96xf32> -> vector<2x96xf32>
    %373 = vector.extract_strided_slice %371 {offsets = [0, 0], sizes = [2, 64], strides = [1, 1]} : vector<2x96xf32> to vector<2x64xf32>
    %374 = vector.extract_strided_slice %372 {offsets = [0, 0], sizes = [2, 64], strides = [1, 1]} : vector<2x96xf32> to vector<2x64xf32>
    %375 = arith.addf %373, %374 : vector<2x64xf32>
    %376 = arith.negf %375 : vector<2x64xf32>
    %377 = math.exp %376 : vector<2x64xf32>
    %cst_109 = arith.constant 1.000000e+00 : f32
    %378 = vector.broadcast %cst_109 : f32 to vector<2x64xf32>
    %379 = arith.addf %378, %377 : vector<2x64xf32>
    %380 = arith.divf %378, %379 : vector<2x64xf32>
    %381 = vector.extract_strided_slice %380 {offsets = [0, 0], sizes = [2, 32], strides = [1, 1]} : vector<2x64xf32> to vector<2x32xf32>
    %382 = vector.extract_strided_slice %380 {offsets = [0, 32], sizes = [2, 32], strides = [1, 1]} : vector<2x64xf32> to vector<2x32xf32>
    %383 = vector.extract_strided_slice %371 {offsets = [0, 64], sizes = [2, 32], strides = [1, 1]} : vector<2x96xf32> to vector<2x32xf32>
    %384 = vector.extract_strided_slice %372 {offsets = [0, 64], sizes = [2, 32], strides = [1, 1]} : vector<2x96xf32> to vector<2x32xf32>
    %385 = vector.broadcast %218 : vector<1x32xf32> to vector<2x32xf32>
    %386 = arith.addf %384, %385 : vector<2x32xf32>
    %387 = arith.mulf %381, %386 : vector<2x32xf32>
    %388 = arith.addf %383, %387 : vector<2x32xf32>
    %389 = math.tanh %388 : vector<2x32xf32>
    %cst_110 = arith.constant 1.000000e+00 : f32
    %390 = vector.broadcast %cst_110 : f32 to vector<2x32xf32>
    %391 = arith.subf %390, %382 : vector<2x32xf32>
    %392 = arith.mulf %391, %389 : vector<2x32xf32>
    %393 = arith.mulf %382, %369 : vector<2x32xf32>
    %394 = arith.addf %392, %393 : vector<2x32xf32>
    %395 = arith.addf %370, %394 : vector<2x32xf32>
    %c14_111 = arith.constant 14 : index
    %c0_112 = arith.constant 0 : index
    %396 = vector.load %arg18[%c14_111, %c0_112] : memref<16x96xf32, #tpu.memory_space<vmem>>, vector<2x96xf32>
    %cst_113 = arith.constant dense<0.000000e+00> : vector<2x96xf32>
    %397 = tpu.matmul %394, %217, %cst_113 {dimension_numbers = #tpu.dot_dimension_numbers<[1], [0], [0], [1], [0, 0, 1, 1], [], []>} : vector<2x32xf32>, vector<32x96xf32>, vector<2x96xf32> -> vector<2x96xf32>
    %398 = vector.extract_strided_slice %396 {offsets = [0, 0], sizes = [2, 64], strides = [1, 1]} : vector<2x96xf32> to vector<2x64xf32>
    %399 = vector.extract_strided_slice %397 {offsets = [0, 0], sizes = [2, 64], strides = [1, 1]} : vector<2x96xf32> to vector<2x64xf32>
    %400 = arith.addf %398, %399 : vector<2x64xf32>
    %401 = arith.negf %400 : vector<2x64xf32>
    %402 = math.exp %401 : vector<2x64xf32>
    %cst_114 = arith.constant 1.000000e+00 : f32
    %403 = vector.broadcast %cst_114 : f32 to vector<2x64xf32>
    %404 = arith.addf %403, %402 : vector<2x64xf32>
    %405 = arith.divf %403, %404 : vector<2x64xf32>
    %406 = vector.extract_strided_slice %405 {offsets = [0, 0], sizes = [2, 32], strides = [1, 1]} : vector<2x64xf32> to vector<2x32xf32>
    %407 = vector.extract_strided_slice %405 {offsets = [0, 32], sizes = [2, 32], strides = [1, 1]} : vector<2x64xf32> to vector<2x32xf32>
    %408 = vector.extract_strided_slice %396 {offsets = [0, 64], sizes = [2, 32], strides = [1, 1]} : vector<2x96xf32> to vector<2x32xf32>
    %409 = vector.extract_strided_slice %397 {offsets = [0, 64], sizes = [2, 32], strides = [1, 1]} : vector<2x96xf32> to vector<2x32xf32>
    %410 = vector.broadcast %218 : vector<1x32xf32> to vector<2x32xf32>
    %411 = arith.addf %409, %410 : vector<2x32xf32>
    %412 = arith.mulf %406, %411 : vector<2x32xf32>
    %413 = arith.addf %408, %412 : vector<2x32xf32>
    %414 = math.tanh %413 : vector<2x32xf32>
    %cst_115 = arith.constant 1.000000e+00 : f32
    %415 = vector.broadcast %cst_115 : f32 to vector<2x32xf32>
    %416 = arith.subf %415, %407 : vector<2x32xf32>
    %417 = arith.mulf %416, %414 : vector<2x32xf32>
    %418 = arith.mulf %407, %394 : vector<2x32xf32>
    %419 = arith.addf %417, %418 : vector<2x32xf32>
    %420 = arith.addf %395, %419 : vector<2x32xf32>
    %cst_116 = arith.constant 1.250000e-01 : f32
    %421 = vector.broadcast %cst_116 : f32 to vector<2x32xf32>
    %422 = arith.mulf %420, %421 : vector<2x32xf32>
    %c0_117 = arith.constant 0 : index
    %c0_118 = arith.constant 0 : index
    %423 = vector.load %arg9[%c0_117, %c0_118] : memref<32x64xf32, #tpu.memory_space<vmem>>, vector<32x64xf32>
    %cst_119 = arith.constant dense<0.000000e+00> : vector<2x64xf32>
    %424 = tpu.matmul %422, %423, %cst_119 {dimension_numbers = #tpu.dot_dimension_numbers<[1], [0], [0], [1], [0, 0, 1, 1], [], []>} : vector<2x32xf32>, vector<32x64xf32>, vector<2x64xf32> -> vector<2x64xf32>
    %c0_120 = arith.constant 0 : index
    %c0_121 = arith.constant 0 : index
    %425 = vector.load %arg10[%c0_120, %c0_121] : memref<1x64xf32, #tpu.memory_space<vmem>>, vector<1x64xf32>
    %426 = vector.broadcast %425 : vector<1x64xf32> to vector<2x64xf32>
    %427 = arith.addf %424, %426 : vector<2x64xf32>
    %cst_122 = arith.constant dense<0.000000e+00> : vector<2xf32>
    %428 = vector.multi_reduction <add>, %427, %cst_122 [1] : vector<2x64xf32> to vector<2xf32>
    %429 = vector.shape_cast %428 : vector<2xf32> to vector<2x1xf32>
    %cst_123 = arith.constant 6.400000e+01 : f32
    %430 = vector.broadcast %cst_123 : f32 to vector<2x1xf32>
    %431 = arith.divf %429, %430 : vector<2x1xf32>
    %432 = vector.broadcast %431 : vector<2x1xf32> to vector<2x64xf32>
    %433 = arith.subf %427, %432 : vector<2x64xf32>
    %434 = arith.mulf %433, %433 : vector<2x64xf32>
    %cst_124 = arith.constant dense<0.000000e+00> : vector<2xf32>
    %435 = vector.multi_reduction <add>, %434, %cst_124 [1] : vector<2x64xf32> to vector<2xf32>
    %436 = vector.shape_cast %435 : vector<2xf32> to vector<2x1xf32>
    %cst_125 = arith.constant 6.400000e+01 : f32
    %437 = vector.broadcast %cst_125 : f32 to vector<2x1xf32>
    %438 = arith.divf %436, %437 : vector<2x1xf32>
    %439 = vector.broadcast %431 : vector<2x1xf32> to vector<2x64xf32>
    %440 = arith.subf %427, %439 : vector<2x64xf32>
    %cst_126 = arith.constant 9.99999974E-6 : f32
    %441 = vector.broadcast %cst_126 : f32 to vector<2x1xf32>
    %442 = arith.addf %438, %441 : vector<2x1xf32>
    %443 = math.rsqrt %442 : vector<2x1xf32>
    %444 = vector.broadcast %443 : vector<2x1xf32> to vector<2x64xf32>
    %445 = arith.mulf %440, %444 : vector<2x64xf32>
    %c0_127 = arith.constant 0 : index
    %c0_128 = arith.constant 0 : index
    %446 = vector.load %arg11[%c0_127, %c0_128] : memref<1x64xf32, #tpu.memory_space<vmem>>, vector<1x64xf32>
    %447 = vector.broadcast %446 : vector<1x64xf32> to vector<2x64xf32>
    %448 = arith.mulf %445, %447 : vector<2x64xf32>
    %c0_129 = arith.constant 0 : index
    %c0_130 = arith.constant 0 : index
    %449 = vector.load %arg12[%c0_129, %c0_130] : memref<1x64xf32, #tpu.memory_space<vmem>>, vector<1x64xf32>
    %450 = vector.broadcast %449 : vector<1x64xf32> to vector<2x64xf32>
    %451 = arith.addf %448, %450 : vector<2x64xf32>
    %cst_131 = arith.constant 0.000000e+00 : f32
    %452 = vector.broadcast %cst_131 : f32 to vector<2x64xf32>
    %453 = arith.maximumf %451, %452 : vector<2x64xf32>
    %c0_132 = arith.constant 0 : index
    %c0_133 = arith.constant 0 : index
    %454 = vector.load %arg13[%c0_132, %c0_133] : memref<1x64xf32, #tpu.memory_space<vmem>>, vector<1x64xf32>
    %455 = vector.broadcast %454 : vector<1x64xf32> to vector<2x64xf32>
    %456 = arith.mulf %453, %455 : vector<2x64xf32>
    %cst_134 = arith.constant dense<0.000000e+00> : vector<2xf32>
    %457 = vector.multi_reduction <add>, %456, %cst_134 [1] : vector<2x64xf32> to vector<2xf32>
    %458 = vector.shape_cast %457 : vector<2xf32> to vector<2x1xf32>
    %c0_135 = arith.constant 0 : index
    %c0_136 = arith.constant 0 : index
    %459 = vector.load %arg14[%c0_135, %c0_136] : memref<1x1xf32, #tpu.memory_space<vmem>>, vector<1x1xf32>
    %460 = vector.broadcast %459 : vector<1x1xf32> to vector<2x1xf32>
    %461 = arith.addf %458, %460 : vector<2x1xf32>
    %462 = arith.negf %461 : vector<2x1xf32>
    %463 = math.exp %462 : vector<2x1xf32>
    %cst_137 = arith.constant 1.000000e+00 : f32
    %464 = vector.broadcast %cst_137 : f32 to vector<2x1xf32>
    %465 = arith.addf %464, %463 : vector<2x1xf32>
    %466 = arith.divf %464, %465 : vector<2x1xf32>
    %c0_138 = arith.constant 0 : index
    %c0_139 = arith.constant 0 : index
    %467 = vector.load %arg15[%c0_138, %c0_139] : memref<2x1xf32, #tpu.memory_space<vmem>>, vector<2x1xf32>
    tpu.vector_store %arg15[%c0_138, %c0_139], %466 {strides = array<i32>} : memref<2x1xf32, #tpu.memory_space<vmem>>, vector<2x1xf32>,
    return
  }
}

</mosaic_0001>

<bundles_post_ra>
// kernel: discriminator_forward.1
= control target key start
LH: loop header
LB: loop body
LE: loop exit
PB: predicated region body
PF: predicated region fallthrough
CT: control target
= control target key end

     0   :  { %s3223_s0 = inlined_call_operand.vmem [shape: f32[16,5], index: 0, kind: input, shape index: {}]   ;;  %s3224_s1 = inlined_call_operand.vmem [shape: f32[5,96], index: 1, kind: input, shape index: {}]   ;;  %s3225_s2 = inlined_call_operand.vmem [shape: f32[32,96], index: 2, kind: input, shape index: {}]   ;;  %s3226_s3 = inlined_call_operand.vmem [shape: f32[1,96], index: 3, kind: input, shape index: {}]   ;;  %s3227_s4 = inlined_call_operand.vmem [shape: f32[1,32], index: 4, kind: input, shape index: {}]   ;;  %s3228_s5 = inlined_call_operand.vmem [shape: f32[32,96], index: 5, kind: input, shape index: {}]   ;;  %s3229_s6 = inlined_call_operand.vmem [shape: f32[32,96], index: 6, kind: input, shape index: {}]   ;;  %s3230_s7 = inlined_call_operand.vmem [shape: f32[1,96], index: 7, kind: input, shape index: {}]   ;;  %s3231_s8 = inlined_call_operand.vmem [shape: f32[1,32], index: 8, kind: input, shape index: {}]   ;;  %s3232_s9 = inlined_call_operand.vmem [shape: f32[32,64], index: 9, kind: input, shape index: {}]   ;;  %s3233_s10 = inlined_call_operand.vmem [shape: f32[1,64], index: 10, kind: input, shape index: {}]   ;;  %s3234_s11 = inlined_call_operand.hbm [shape: f32[1,64], index: 11, kind: input, shape index: {}]   ;;  %s3235_s12 = inlined_call_operand.hbm [shape: f32[1,64], index: 12, kind: input, shape index: {}]   ;;  %s3236_s13 = inlined_call_operand.hbm [shape: f32[1,64], index: 13, kind: input, shape index: {}]   ;;  %s3237_s14 = inlined_call_operand.<no memory space> [shape: f32[1,1], index: 14, kind: input, shape index: {}]   ;;  %s3238_s15 = inlined_call_operand.vmem [shape: f32[2,1], index: 15, kind: output, shape index: {}]  }
   0x1   :  { %v20_v0 = vstv %s3237_s14 }
   0x2   :  { %21 = vst [vmem:[#allocation5] sm:$0x1] %v20_v0 }
   0x3   :  { %22 = vsyncpa [#allocation7], 0 }
   0x4   :  { %23 = vsyncpa [#allocation9], 0  ;;  %s2763_s20 = smov [#allocation8]   ;;  %s2764_s22 = smov [#allocation6]  }
   0x5   :  { %s62_s21 = sshll.u32 %s2763_s20, 4  ;;  %s52_s23 = sshll.u32 %s2764_s22, 4  ;;  %s63_s21 = int_to_ptr.vmem [resolvable:$true] %s62_s21  ;;  %s53_s23 = int_to_ptr.vmem [resolvable:$true] %s52_s23 }
   0x6   :  { %s2693_s26 = scalar_lea.hbm %s3235_s12, 16 }
   0x7   :  { %p2694_p0 = scmp.ne.s32.totalorder %s3235_s12, %s2693_s26  ;;  %p2697_p1 = scmp.lt.u32.totalorder %s2693_s26, %s3235_s12 }
   0x9   :  { %p2699_p2 = pnand %p2697_p1, %p2694_p0 }
   0xb   :  { %2702 = shalt.err (!%p2699_p2)
}
   0xc   :  { %s2703_s14 = scalar_lea.vmem %s63_s21, 16  ;;  %s2707_s16 = scalar_lea.vmem %s63_s21, 32 }
   0xd   :  { %p2704_p3 = scmp.ne.s32.totalorder %s63_s21, %s2703_s14  ;;  %p2708_p4 = scmp.lt.s32.totalorder %s63_s21, %s63_s21 }
   0xe   :  { %p2709_p5 = scmp.lt.s32.totalorder %s2707_s16, %s2703_s14 }
  0x10   :  { %p2710_p6 = por %p2709_p5, %p2708_p4 }
  0x12   :  { %p2711_p7 = pnand %p2710_p6, %p2704_p3 }
  0x14   :  { %2714 = shalt.err (!%p2711_p7)
}
  0x15   :  { %65 = dma.hbm_to_vmem [thread:$0]  %s3235_s12, 16, %s63_s21, [#allocation9]  }
  0x16   :  { %s2715_s22 = scalar_lea.hbm %s3234_s11, 16 }
  0x17   :  { %p2716_p8 = scmp.ne.s32.totalorder %s3234_s11, %s2715_s22  ;;  %p2719_p9 = scmp.lt.u32.totalorder %s2715_s22, %s3234_s11 }
  0x19   :  { %p2721_p10 = pnand %p2719_p9, %p2716_p8 }
  0x1b   :  { %2724 = shalt.err (!%p2721_p10)
}
  0x1c   :  { %s2725_s28 = scalar_lea.vmem %s53_s23, 16  ;;  %s2729_s29 = scalar_lea.vmem %s53_s23, 32 }
  0x1d   :  { %p2726_p11 = scmp.ne.s32.totalorder %s53_s23, %s2725_s28  ;;  %p2730_p12 = scmp.lt.s32.totalorder %s53_s23, %s53_s23 }
  0x1e   :  { %p2731_p13 = scmp.lt.s32.totalorder %s2729_s29, %s2725_s28 }
  0x20   :  { %p2732_p0 = por %p2731_p13, %p2730_p12 }
  0x22   :  { %p2733_p1 = pnand %p2732_p0, %p2726_p11 }
  0x24   :  { %2736 = shalt.err (!%p2733_p1)
}
  0x25   :  { %55 = dma.hbm_to_vmem [thread:$0]  %s3234_s11, 16, %s53_s23, [#allocation7]  }
  0x26   :  { %s2765_s30 = smov [#allocation10]   ;;  %s2737_s18 = scalar_lea.hbm %s3236_s13, 16 }
  0x27   :  { %s72_s14 = sshll.u32 %s2765_s30, 4  ;;  %p2738_p2 = scmp.ne.s32.totalorder %s3236_s13, %s2737_s18  ;;  %s73_s14 = int_to_ptr.vmem [resolvable:$true] %s72_s14 }
  0x28   :  { %p2741_p3 = scmp.lt.u32.totalorder %s2737_s18, %s3236_s13 }
  0x2a   :  { %p2743_p4 = pnand %p2741_p3, %p2738_p2 }
  0x2c   :  { %2746 = shalt.err (!%p2743_p4)
}
  0x2d   :  { %s2747_s25 = scalar_lea.vmem %s73_s14, 16  ;;  %s2751_s11 = scalar_lea.vmem %s73_s14, 32 }
  0x2e   :  { %p2748_p5 = scmp.ne.s32.totalorder %s73_s14, %s2747_s25  ;;  %p2752_p6 = scmp.lt.s32.totalorder %s73_s14, %s73_s14 }
  0x2f   :  { %p2753_p7 = scmp.lt.s32.totalorder %s2751_s11, %s2747_s25 }
  0x31   :  { %p2754_p8 = por %p2753_p7, %p2752_p6 }
  0x33   :  { %p2755_p9 = pnand %p2754_p8, %p2748_p5 }
  0x35   :  { %2758 = shalt.err (!%p2755_p9)
}
  0x36   :  { %75 = dma.hbm_to_vmem [thread:$0]  %s3236_s13, 16, %s73_s14, [#allocation9]  }
  0x37   :  { %2759 = dma.done.wait [#allocation7], 16  }
  0x38   :  { %2760 = vsyncadd [#allocation7], 4294967280 }
  0x39   :  { %2761 = dma.done.wait [#allocation9], 32  }
  0x3a   :  { %2762 = vsyncadd [#allocation9], 4294967264  ;;  %v2766_v1 = vmov 0.0|0.0   ;;  %vm2767_vm0 = vmmov 0   ;;  %v2768_v2 = vmov 0.0   ;;  %vm104_vm1 = vcmask 1044480  }
  0x3b   :  { %2473 = vmatprep.subr.bf16.mxu1 %v2766_v1  ;;  %2283 = vmatprep.mubr.msk.f32.mxu1 %vm2767_vm0, %v2768_v2  ;;  %vm97_vm2 = vcmask 39936   ;;  %v89_v3 = vld [vmem:[%s3224_s1] sm:$0x1f]  ;;  %v88_v5 = vld [vmem:[%s3223_s0 + $0x8] sm:$0xff]  ;;  %v188_v8 = vld [vmem:[%s3225_s2 + $0x10] sm:$0xff]  ;;  %s2769_s24 = smov 64  }
  0x3c   :  { %v87_v4 = vld [vmem:[%s3223_s0] sm:$0xff]  ;;  %2270 = vmatprep.subr.msk.mxu0 %vm104_vm1, %v89_v3  ;;  %v187_v7 = vld [vmem:[%s3225_s2 + $0x8] sm:$0xff]  ;;  %v189_v10 = vld [vmem:[%s3225_s2 + $0x18] sm:$0xff]  ;;  %vm183_vm3 = vcmask 785408   ;;  %vm305_vm4 = vcmask 254976   ;;  %vm192_vm5 = vcmask 261120  }
  0x3d   :  { %2272 = vmatprep.mubr.msk.f32.mxu0 %vm97_vm2, %v87_v4  ;;  %v186_v6 = vld [vmem:[%s3225_s2] sm:$0xff]  ;;  %2271 = vmatpush3.msk.msra.mxu0 %vm104_vm1, %v89_v3  ;;  %v2921_v12 = vpack.c.bf16 %v189_v10, %v188_v8  ;;  %vm2065_vm6 = vcmask 517120   ;;  %vm2122_vm7 = vcmask 1024  }
  0x3e   :  { %v2911_v9 = vpack.c.bf16 %v187_v7, %v186_v6  ;;  %v2135_v11 = vld [vmem:[%s3227_s4] ss:$0 sm:$0xff]  ;;  %2273 = vmatmul.mubr.msk.f32.vlgmr.msra.gmra.mrb[0].mxu0 %vm97_vm2, %v88_v5  ;;  %2479 = vmatprep.subr.bf16.mxu0 %v2766_v1 }
  0x3f   :  { %278 = vrot.lane.b32.xlu0 %v2135_v11, %s2769_s24  ;;  %2294 = vmatprep.mubr.msk.f32.mxu0 %vm2767_vm0, %v2768_v2  ;;  %v2130_v13 = vld [vmem:[%s3226_s3] ss:$0 sm:$0xff]  ;;  %s2770_s3 = smov 96  }
  0x40   :  { %2475 = vmatpush3.bf16.msra.mxu1 %v2911_v9  ;;  %2481 = vmatpush3.bf16.msra.mxu0 %v2911_v9 }
  0x41   :  { %2476 = vmatprep.subr.bf16.mxu1 %v2766_v1  ;;  %2482 = vmatprep.subr.bf16.mxu0 %v2766_v1 }
  0x44   :  { %2478 = vmatpush3.bf16.msra.mxu1 %v2921_v12  ;;  %2484 = vmatpush3.bf16.msra.mxu0 %v2921_v12 }
  0x45   :  { %2485 = vmatprep.subr.bf16.mxu1 %v2766_v1  ;;  %2491 = vmatprep.subr.bf16.mxu0 %v2766_v1 }
  0x47   :  { %2284 = vmatmul.mubr.f32.vlgmr.msra.gmra.mrb[0].mxu1 %v2768_v2 }
  0x48   :  { %2487 = vmatpush3.bf16.msra.mxu1 %v2911_v9  ;;  %2305 = vmatprep.mubr.msk.f32.mxu1 %vm2767_vm0, %v2768_v2 }
  0x49   :  { %2488 = vmatprep.subr.bf16.mxu1 %v2766_v1 }
  0x4c   :  { %2490 = vmatpush3.bf16.msra.mxu1 %v2921_v12 }
  0x4d   :  { %2497 = vmatprep.subr.bf16.mxu1 %v2766_v1 }
  0xb1   :  { %v2945_v18 = vpop.permute.xlu0 %278 }
 0x111   :  { %v2274_v14 = vpop.f32.mrb[0].mxu0 }
 0x112   :  { %v180_v15 = vadd.f32 %v2274_v14, %v2130_v13  ;;  %v174_v16 = vpop.f32.mrb[1].mxu0 }
 0x113   :  { %v175_v17 = vadd.f32 %v2130_v13, %v174_v16 }
 0x114   :  { %185 = vst.msk [vmem:[#allocation4 + $0x8] sm:$0xff] %vm183_vm3, %v180_v15 }
 0x115   :  { %184 = vst.msk [vmem:[#allocation4] sm:$0xff] %vm183_vm3, %v175_v17 }
 0x11a   :  { %v262_v19 = vpop.f32.mrb[0].mxu1 }
 0x11b   :  { %v281_v20 = vadd.f32 %v2945_v18, %v262_v19  ;;  %v2285_v21 = vpop.f32.mrb[1].mxu1 }
 0x11c   :  { %v191_v22 = vld [vmem:[#allocation4] sm:$0x3]  ;;  %v307_v42 = vld [vmem:[#allocation4 + $0x2] sm:$0x3]  ;;  %v412_v62 = vld [vmem:[#allocation4 + $0x4] sm:$0x3] }
 0x11d   :  { %283 = vrot.lane.b32.xlu0 %v281_v20, %s2769_s24  ;;  %v266_v23 = vadd.f32 %v262_v19, %v191_v22 }
 0x11f   :  { %v2134_v24 = vmul.f32 -1.442695, %v266_v23  ;;  %v517_v23 = vld [vmem:[#allocation4 + $0x6] sm:$0x3] }
 0x121   :  { %2591 = vpow2.f32 %v2134_v24 }
 0x12b   :  { %v2592_v25 = vpop.eup %2591 }
 0x12c   :  { %v270_v26 = vadd.f32 1.0, %v2592_v25 }
 0x12e   :  { %2593 = vrcp.f32 %v270_v26 }
 0x138   :  { %v2594_v27 = vpop.eup %2593 }
 0x139   :  { %v293_v33 = vsub.f32 1.0, %v2594_v27  ;;  %v299_v35 = vmul.f32 0.0, %v2594_v27 }
 0x18f   :  { %v284_v28 = vpop.permute.xlu0 %283 }
 0x190   :  { %v286_v29 = vmul.f32 %v2594_v27, %v284_v28 }
 0x192   :  { %288 = vrot.lane.b32.xlu1 %v286_v29, %s2769_s24 }
 0x204   :  { %v289_v30 = vpop.permute.xlu1 %288 }
 0x205   :  { %v291_v31 = vadd.f32 %v289_v30, %v191_v22 }
 0x207   :  { %2595 = vtanh.f32 %v291_v31 }
 0x211   :  { %v2596_v32 = vpop.eup %2595 }
 0x212   :  { %295 = vrot.lane.b32.xlu1 %v2596_v32, %s2770_s3 }
 0x284   :  { %v296_v34 = vpop.permute.xlu1 %295 }
 0x285   :  { %v298_v36 = vmul.f32 %v296_v34, %v293_v33 }
 0x287   :  { %v300_v37 = vadd.f32 %v299_v35, %v298_v36 }
 0x289   :  { %302 = vrot.lane.b32.xlu0 %v300_v37, %s2770_s3 }
 0x2fb   :  { %v303_v38 = vpop.permute.xlu0 %302 }
 0x2fc   :  { %306 = vst.msk [vmem:[#allocation2] sm:$0x3] %vm305_vm4, %v303_v38  ;;  %2295 = vmatmul.mubr.msk.f32.vlgmr.msra.gmra.mrb[2].mxu0 %vm192_vm5, %v303_v38 }
 0x2fd   :  { %2493 = vmatpush3.bf16.msra.mxu0 %v2911_v9  ;;  %2316 = vmatprep.mubr.msk.f32.mxu0 %vm2767_vm0, %v2768_v2 }
 0x2fe   :  { %2494 = vmatprep.subr.bf16.mxu0 %v2766_v1 }
 0x301   :  { %2496 = vmatpush3.bf16.msra.mxu0 %v2921_v12 }
 0x302   :  { %2503 = vmatprep.subr.bf16.mxu0 %v2766_v1 }
 0x3cf   :  { %v376_v39 = vpop.f32.mrb[2].mxu0 }
 0x3d0   :  { %v387_v40 = vadd.f32 %v376_v39, %v2945_v18  ;;  %v2296_v41 = vpop.f32.mrb[3].mxu0  ;;  %v380_v43 = vadd.f32 %v376_v39, %v307_v42 }
 0x3d2   :  { %389 = vrot.lane.b32.xlu1 %v387_v40, %s2769_s24  ;;  %v2137_v44 = vmul.f32 -1.442695, %v380_v43  ;;  %v622_v43 = vld [vmem:[#allocation4 + $0x8] sm:$0x3] }
 0x3d4   :  { %2597 = vpow2.f32 %v2137_v44 }
 0x3de   :  { %v2598_v45 = vpop.eup %2597 }
 0x3df   :  { %v384_v46 = vadd.f32 1.0, %v2598_v45 }
 0x3e1   :  { %2599 = vrcp.f32 %v384_v46 }
 0x3eb   :  { %v2600_v47 = vpop.eup %2599 }
 0x3ec   :  { %v399_v53 = vsub.f32 1.0, %v2600_v47  ;;  %v405_v55 = vmul.f32 %v2600_v47, %v300_v37 }
 0x444   :  { %v390_v48 = vpop.permute.xlu1 %389 }
 0x445   :  { %v392_v49 = vmul.f32 %v2600_v47, %v390_v48 }
 0x447   :  { %394 = vrot.lane.b32.xlu0 %v392_v49, %s2769_s24 }
 0x4b9   :  { %v395_v50 = vpop.permute.xlu0 %394 }
 0x4ba   :  { %v397_v51 = vadd.f32 %v395_v50, %v307_v42 }
 0x4bc   :  { %2601 = vtanh.f32 %v397_v51 }
 0x4c6   :  { %v2602_v52 = vpop.eup %2601 }
 0x4c7   :  { %401 = vrot.lane.b32.xlu1 %v2602_v52, %s2770_s3 }
 0x539   :  { %v402_v54 = vpop.permute.xlu1 %401 }
 0x53a   :  { %v404_v56 = vmul.f32 %v402_v54, %v399_v53 }
 0x53c   :  { %v406_v57 = vadd.f32 %v405_v55, %v404_v56 }
 0x53e   :  { %408 = vrot.lane.b32.xlu0 %v406_v57, %s2770_s3 }
 0x5b0   :  { %v409_v58 = vpop.permute.xlu0 %408 }
 0x5b1   :  { %411 = vst.msk [vmem:[#allocation2 + $0x2] sm:$0x3] %vm305_vm4, %v409_v58  ;;  %2306 = vmatmul.mubr.msk.f32.vlgmr.msra.gmra.mrb[2].mxu1 %vm192_vm5, %v409_v58 }
 0x5b2   :  { %2499 = vmatpush3.bf16.msra.mxu1 %v2911_v9  ;;  %2327 = vmatprep.mubr.msk.f32.mxu1 %vm2767_vm0, %v2768_v2 }
 0x5b3   :  { %2500 = vmatprep.subr.bf16.mxu1 %v2766_v1 }
 0x5b6   :  { %2502 = vmatpush3.bf16.msra.mxu1 %v2921_v12 }
 0x5b7   :  { %2509 = vmatprep.subr.bf16.mxu1 %v2766_v1 }
 0x684   :  { %v481_v59 = vpop.f32.mrb[2].mxu1 }
 0x685   :  { %v492_v60 = vadd.f32 %v481_v59, %v2945_v18  ;;  %v2307_v61 = vpop.f32.mrb[3].mxu1  ;;  %v485_v63 = vadd.f32 %v481_v59, %v412_v62 }
 0x687   :  { %494 = vrot.lane.b32.xlu1 %v492_v60, %s2769_s24  ;;  %v2139_v0 = vmul.f32 -1.442695, %v485_v63  ;;  %v727_v63 = vld [vmem:[#allocation4 + $0xa] sm:$0x3] }
 0x689   :  { %2603 = vpow2.f32 %v2139_v0 }
 0x693   :  { %v2604_v3 = vpop.eup %2603 }
 0x694   :  { %v489_v4 = vadd.f32 1.0, %v2604_v3 }
 0x696   :  { %2605 = vrcp.f32 %v489_v4 }
 0x6a0   :  { %v2606_v5 = vpop.eup %2605 }
 0x6a1   :  { %v504_v13 = vsub.f32 1.0, %v2606_v5  ;;  %v510_v15 = vmul.f32 %v2606_v5, %v406_v57 }
 0x6f9   :  { %v495_v6 = vpop.permute.xlu1 %494 }
 0x6fa   :  { %v497_v7 = vmul.f32 %v2606_v5, %v495_v6 }
 0x6fc   :  { %499 = vrot.lane.b32.xlu0 %v497_v7, %s2769_s24 }
 0x76e   :  { %v500_v8 = vpop.permute.xlu0 %499 }
 0x76f   :  { %v502_v10 = vadd.f32 %v500_v8, %v412_v62 }
 0x771   :  { %2607 = vtanh.f32 %v502_v10 }
 0x77b   :  { %v2608_v11 = vpop.eup %2607 }
 0x77c   :  { %506 = vrot.lane.b32.xlu1 %v2608_v11, %s2770_s3 }
 0x7ee   :  { %v507_v14 = vpop.permute.xlu1 %506 }
 0x7ef   :  { %v509_v16 = vmul.f32 %v507_v14, %v504_v13 }
 0x7f1   :  { %v511_v17 = vadd.f32 %v510_v15, %v509_v16 }
 0x7f3   :  { %513 = vrot.lane.b32.xlu0 %v511_v17, %s2770_s3 }
 0x865   :  { %v514_v19 = vpop.permute.xlu0 %513 }
 0x866   :  { %516 = vst.msk [vmem:[#allocation2 + $0x4] sm:$0x3] %vm305_vm4, %v514_v19  ;;  %2317 = vmatmul.mubr.msk.f32.vlgmr.msra.gmra.mrb[4].mxu0 %vm192_vm5, %v514_v19 }
 0x867   :  { %2505 = vmatpush3.bf16.msra.mxu0 %v2911_v9  ;;  %2338 = vmatprep.mubr.msk.f32.mxu0 %vm2767_vm0, %v2768_v2 }
 0x868   :  { %2506 = vmatprep.subr.bf16.mxu0 %v2766_v1 }
 0x86b   :  { %2508 = vmatpush3.bf16.msra.mxu0 %v2921_v12 }
 0x86c   :  { %2515 = vmatprep.subr.bf16.mxu0 %v2766_v1 }
 0x939   :  { %v586_v20 = vpop.f32.mrb[4].mxu0 }
 0x93a   :  { %v597_v21 = vadd.f32 %v586_v20, %v2945_v18  ;;  %v2318_v22 = vpop.f32.mrb[5].mxu0  ;;  %v590_v24 = vadd.f32 %v586_v20, %v517_v23 }
 0x93c   :  { %599 = vrot.lane.b32.xlu1 %v597_v21, %s2769_s24  ;;  %v2141_v25 = vmul.f32 -1.442695, %v590_v24 }
 0x93e   :  { %2609 = vpow2.f32 %v2141_v25 }
 0x948   :  { %v2610_v26 = vpop.eup %2609 }
 0x949   :  { %v594_v27 = vadd.f32 1.0, %v2610_v26 }
 0x94b   :  { %2611 = vrcp.f32 %v594_v27 }
 0x955   :  { %v2612_v28 = vpop.eup %2611 }
 0x956   :  { %v609_v34 = vsub.f32 1.0, %v2612_v28  ;;  %v615_v36 = vmul.f32 %v2612_v28, %v511_v17 }
 0x9ae   :  { %v600_v29 = vpop.permute.xlu1 %599 }
 0x9af   :  { %v602_v30 = vmul.f32 %v2612_v28, %v600_v29 }
 0x9b1   :  { %604 = vrot.lane.b32.xlu0 %v602_v30, %s2769_s24 }
 0xa23   :  { %v605_v31 = vpop.permute.xlu0 %604 }
 0xa24   :  { %v607_v32 = vadd.f32 %v605_v31, %v517_v23  ;;  %v832_v23 = vld [vmem:[#allocation4 + $0xc] sm:$0x3] }
 0xa26   :  { %2613 = vtanh.f32 %v607_v32 }
 0xa30   :  { %v2614_v33 = vpop.eup %2613 }
 0xa31   :  { %611 = vrot.lane.b32.xlu1 %v2614_v33, %s2770_s3 }
 0xaa3   :  { %v612_v35 = vpop.permute.xlu1 %611 }
 0xaa4   :  { %v614_v37 = vmul.f32 %v612_v35, %v609_v34 }
 0xaa6   :  { %v616_v38 = vadd.f32 %v615_v36, %v614_v37 }
 0xaa8   :  { %618 = vrot.lane.b32.xlu0 %v616_v38, %s2770_s3 }
 0xb1a   :  { %v619_v39 = vpop.permute.xlu0 %618 }
 0xb1b   :  { %621 = vst.msk [vmem:[#allocation2 + $0x6] sm:$0x3] %vm305_vm4, %v619_v39  ;;  %2328 = vmatmul.mubr.msk.f32.vlgmr.msra.gmra.mrb[4].mxu1 %vm192_vm5, %v619_v39 }
 0xb1c   :  { %2511 = vmatpush3.bf16.msra.mxu1 %v2911_v9  ;;  %2349 = vmatprep.mubr.msk.f32.mxu1 %vm2767_vm0, %v2768_v2 }
 0xb1d   :  { %2512 = vmatprep.subr.bf16.mxu1 %v2766_v1 }
 0xb20   :  { %2514 = vmatpush3.bf16.msra.mxu1 %v2921_v12 }
 0xb22   :  { %v1042_v19 = vld [vmem:[#allocation2] sm:$0xff] }
 0xbee   :  { %v691_v40 = vpop.f32.mrb[4].mxu1 }
 0xbef   :  { %v702_v41 = vadd.f32 %v691_v40, %v2945_v18  ;;  %v2329_v42 = vpop.f32.mrb[5].mxu1  ;;  %v695_v44 = vadd.f32 %v691_v40, %v622_v43 }
 0xbf1   :  { %704 = vrot.lane.b32.xlu1 %v702_v41, %s2769_s24  ;;  %v2143_v45 = vmul.f32 -1.442695, %v695_v44 }
 0xbf3   :  { %2615 = vpow2.f32 %v2143_v45 }
 0xbfd   :  { %v2616_v46 = vpop.eup %2615 }
 0xbfe   :  { %v699_v47 = vadd.f32 1.0, %v2616_v46 }
 0xc00   :  { %2617 = vrcp.f32 %v699_v47 }
 0xc0a   :  { %v2618_v48 = vpop.eup %2617 }
 0xc0b   :  { %v714_v54 = vsub.f32 1.0, %v2618_v48  ;;  %v720_v56 = vmul.f32 %v2618_v48, %v616_v38 }
 0xc63   :  { %v705_v49 = vpop.permute.xlu1 %704 }
 0xc64   :  { %v707_v50 = vmul.f32 %v2618_v48, %v705_v49 }
 0xc66   :  { %709 = vrot.lane.b32.xlu0 %v707_v50, %s2769_s24 }
 0xcd8   :  { %v710_v51 = vpop.permute.xlu0 %709 }
 0xcd9   :  { %v712_v52 = vadd.f32 %v710_v51, %v622_v43  ;;  %v937_v43 = vld [vmem:[#allocation4 + $0xe] sm:$0x3] }
 0xcdb   :  { %2619 = vtanh.f32 %v712_v52 }
 0xce5   :  { %v2620_v53 = vpop.eup %2619 }
 0xce6   :  { %716 = vrot.lane.b32.xlu1 %v2620_v53, %s2770_s3  ;;  %v1139_v53 = vld [vmem:[%s3229_s6 + $0x8] sm:$0xff] }
 0xd58   :  { %v717_v55 = vpop.permute.xlu1 %716 }
 0xd59   :  { %v719_v57 = vmul.f32 %v717_v55, %v714_v54  ;;  %v1140_v54 = vld [vmem:[%s3229_s6 + $0x10] sm:$0xff] }
 0xd5b   :  { %v721_v58 = vadd.f32 %v720_v56, %v719_v57  ;;  %v1141_v56 = vld [vmem:[%s3229_s6 + $0x18] sm:$0xff] }
 0xd5c   :  { %v3046_v57 = vpack.c.bf16 %v1141_v56, %v1140_v54 }
 0xd5d   :  { %723 = vrot.lane.b32.xlu0 %v721_v58, %s2770_s3 }
 0xdcf   :  { %v724_v59 = vpop.permute.xlu0 %723 }
 0xdd0   :  { %726 = vst.msk [vmem:[#allocation2 + $0x8] sm:$0x3] %vm305_vm4, %v724_v59  ;;  %2339 = vmatmul.mubr.msk.f32.vlgmr.msra.gmra.mrb[6].mxu0 %vm192_vm5, %v724_v59  ;;  %v1044_v59 = vld [vmem:[%s3228_s5] sm:$0xff] }
 0xdd1   :  { %2517 = vmatpush3.bf16.msra.mxu0 %v2911_v9  ;;  %2360 = vmatprep.mubr.msk.f32.mxu0 %vm2767_vm0, %v2768_v2 }
 0xdd2   :  { %2518 = vmatprep.subr.bf16.mxu0 %v2766_v1 }
 0xdd5   :  { %2520 = vmatpush3.bf16.msra.mxu0 %v2921_v12 }
 0xdd6   :  { %2529 = vmatprep.subr.bf16.mxu0 %v2766_v1 }
 0xea3   :  { %v796_v60 = vpop.f32.mrb[6].mxu0 }
 0xea4   :  { %v807_v61 = vadd.f32 %v796_v60, %v2945_v18  ;;  %v2340_v62 = vpop.f32.mrb[7].mxu0  ;;  %v800_v0 = vadd.f32 %v796_v60, %v727_v63  ;;  %v1045_v60 = vld [vmem:[%s3228_s5 + $0x8] sm:$0xff] }
 0xea5   :  { %v1046_v62 = vld [vmem:[%s3228_s5 + $0x10] sm:$0xff] }
 0xea6   :  { %809 = vrot.lane.b32.xlu1 %v807_v61, %s2769_s24  ;;  %v2145_v3 = vmul.f32 -1.442695, %v800_v0  ;;  %v2521_v61 = vpack.c.bf16 %v1045_v60, %v1044_v59 }
 0xea8   :  { %2621 = vpow2.f32 %v2145_v3  ;;  %2522 = vmatprep.subr.bf16.mxu1 %v2521_v61 }
 0xeb2   :  { %v2622_v9 = vpop.eup %2621 }
 0xeb3   :  { %v804_v4 = vadd.f32 1.0, %v2622_v9 }
 0xeb5   :  { %2623 = vrcp.f32 %v804_v4  ;;  %v2154_v4 = vld [vmem:[%s3231_s8] ss:$0 sm:$0xff] }
 0xebf   :  { %v2624_v5 = vpop.eup %2623 }
 0xec0   :  { %v819_v11 = vsub.f32 1.0, %v2624_v5  ;;  %v825_v14 = vmul.f32 %v2624_v5, %v721_v58 }
 0xf18   :  { %v810_v6 = vpop.permute.xlu1 %809 }
 0xf19   :  { %v812_v7 = vmul.f32 %v2624_v5, %v810_v6 }
 0xf1b   :  { %814 = vrot.lane.b32.xlu0 %v812_v7, %s2769_s24 }
 0xf8d   :  { %v815_v12 = vpop.permute.xlu0 %814 }
 0xf8e   :  { %v817_v8 = vadd.f32 %v815_v12, %v727_v63  ;;  %v1047_v63 = vld [vmem:[%s3228_s5 + $0x18] sm:$0xff] }
 0xf8f   :  { %v2525_v0 = vpack.c.bf16 %v1047_v63, %v1046_v62 }
 0xf90   :  { %2625 = vtanh.f32 %v817_v8 }
 0xf9a   :  { %v2626_v10 = vpop.eup %2625 }
 0xf9b   :  { %821 = vrot.lane.b32.xlu1 %v2626_v10, %s2770_s3 }
0x100d   :  { %v822_v13 = vpop.permute.xlu1 %821 }
0x100e   :  { %v824_v15 = vmul.f32 %v822_v13, %v819_v11 }
0x1010   :  { %v826_v16 = vadd.f32 %v825_v14, %v824_v15  ;;  %v2150_v15 = vld [vmem:[%s3230_s7] ss:$0 sm:$0xff] }
0x1012   :  { %828 = vrot.lane.b32.xlu0 %v826_v16, %s2770_s3 }
0x1084   :  { %v829_v17 = vpop.permute.xlu0 %828 }
0x1085   :  { %831 = vst.msk [vmem:[#allocation2 + $0xa] sm:$0x3] %vm305_vm4, %v829_v17  ;;  %2350 = vmatmul.mubr.msk.f32.vlgmr.msra.gmra.mrb[6].mxu1 %vm192_vm5, %v829_v17 }
0x1086   :  { %2371 = vmatprep.mubr.msk.f32.mxu1 %vm192_vm5, %v1042_v19  ;;  %2524 = vmatpush3.bf16.msra.mxu1 %v2521_v61 }
0x1087   :  { %2526 = vmatprep.subr.bf16.mxu1 %v2525_v0 }
0x108a   :  { %2528 = vmatpush3.bf16.msra.mxu1 %v2525_v0 }
0x108b   :  { %2535 = vmatprep.subr.bf16.mxu1 %v2766_v1 }
0x1158   :  { %v901_v20 = vpop.f32.mrb[6].mxu1 }
0x1159   :  { %v912_v21 = vadd.f32 %v901_v20, %v2945_v18  ;;  %v2351_v22 = vpop.f32.mrb[7].mxu1  ;;  %v905_v24 = vadd.f32 %v901_v20, %v832_v23 }
0x115b   :  { %914 = vrot.lane.b32.xlu1 %v912_v21, %s2769_s24  ;;  %v2147_v25 = vmul.f32 -1.442695, %v905_v24 }
0x115d   :  { %2627 = vpow2.f32 %v2147_v25 }
0x1167   :  { %v2628_v26 = vpop.eup %2627 }
0x1168   :  { %v909_v27 = vadd.f32 1.0, %v2628_v26 }
0x116a   :  { %2629 = vrcp.f32 %v909_v27 }
0x1174   :  { %v2630_v28 = vpop.eup %2629 }
0x1175   :  { %v924_v34 = vsub.f32 1.0, %v2630_v28  ;;  %v930_v36 = vmul.f32 %v2630_v28, %v826_v16 }
0x11cd   :  { %v915_v29 = vpop.permute.xlu1 %914 }
0x11ce   :  { %v917_v30 = vmul.f32 %v2630_v28, %v915_v29 }
0x11d0   :  { %919 = vrot.lane.b32.xlu0 %v917_v30, %s2769_s24 }
0x1242   :  { %v920_v31 = vpop.permute.xlu0 %919 }
0x1243   :  { %v922_v32 = vadd.f32 %v920_v31, %v832_v23 }
0x1245   :  { %2631 = vtanh.f32 %v922_v32 }
0x124f   :  { %v2632_v33 = vpop.eup %2631 }
0x1250   :  { %926 = vrot.lane.b32.xlu1 %v2632_v33, %s2770_s3 }
0x12c2   :  { %v927_v35 = vpop.permute.xlu1 %926 }
0x12c3   :  { %v929_v37 = vmul.f32 %v927_v35, %v924_v34 }
0x12c5   :  { %v931_v38 = vadd.f32 %v930_v36, %v929_v37 }
0x12c7   :  { %933 = vrot.lane.b32.xlu0 %v931_v38, %s2770_s3 }
0x1339   :  { %v934_v39 = vpop.permute.xlu0 %933 }
0x133a   :  { %936 = vst.msk [vmem:[#allocation2 + $0xc] sm:$0x3] %vm305_vm4, %v934_v39  ;;  %2361 = vmatmul.mubr.msk.f32.vlgmr.msra.gmra.mrb[8].mxu0 %vm192_vm5, %v934_v39 }
0x133b   :  { %2382 = vmatprep.mubr.msk.f32.mxu0 %vm2767_vm0, %v2768_v2 }
0x140d   :  { %v1006_v40 = vpop.f32.mrb[8].mxu0 }
0x140e   :  { %v1017_v41 = vadd.f32 %v1006_v40, %v2945_v18  ;;  %v2362_v42 = vpop.f32.mrb[9].mxu0  ;;  %v1010_v44 = vadd.f32 %v1006_v40, %v937_v43  ;;  %v1138_v18 = vld [vmem:[%s3229_s6] sm:$0xff] }
0x140f   :  { %v3040_v55 = vpack.c.bf16 %v1139_v53, %v1138_v18 }
0x1410   :  { %1019 = vrot.lane.b32.xlu1 %v1017_v41, %s2769_s24  ;;  %v2149_v45 = vmul.f32 -1.442695, %v1010_v44 }
0x1411   :  { %2531 = vmatpush3.bf16.msra.mxu0 %v3040_v55 }
0x1412   :  { %2633 = vpow2.f32 %v2149_v45  ;;  %2532 = vmatprep.subr.bf16.mxu0 %v2766_v1 }
0x1415   :  { %2534 = vmatpush3.bf16.msra.mxu0 %v3046_v57 }
0x1416   :  { %2541 = vmatprep.subr.bf16.mxu0 %v2766_v1 }
0x1418   :  { %2383 = vmatmul.mubr.f32.vlgmr.msra.gmra.mrb[10].mxu0 %v2768_v2 }
0x1419   :  { %2543 = vmatpush3.bf16.msra.mxu0 %v3040_v55  ;;  %2404 = vmatprep.mubr.msk.f32.mxu0 %vm2767_vm0, %v2768_v2 }
0x141a   :  { %2544 = vmatprep.subr.bf16.mxu0 %v2766_v1 }
0x141c   :  { %v2634_v46 = vpop.eup %2633 }
0x141d   :  { %v1014_v47 = vadd.f32 1.0, %v2634_v46  ;;  %2546 = vmatpush3.bf16.msra.mxu0 %v3046_v57 }
0x141e   :  { %2553 = vmatprep.subr.bf16.mxu0 %v2766_v1 }
0x141f   :  { %2635 = vrcp.f32 %v1014_v47 }
0x1429   :  { %v2636_v48 = vpop.eup %2635 }
0x142a   :  { %v1029_v3 = vsub.f32 1.0, %v2636_v48  ;;  %v1035_v5 = vmul.f32 %v2636_v48, %v931_v38 }
0x1482   :  { %v1020_v49 = vpop.permute.xlu1 %1019 }
0x1483   :  { %v1022_v50 = vmul.f32 %v2636_v48, %v1020_v49 }
0x1485   :  { %1024 = vrot.lane.b32.xlu0 %v1022_v50, %s2769_s24 }
0x14eb   :  { %v1210_v12 = vpop.f32.mrb[10].mxu0 }
0x14ec   :  { %v2384_v8 = vpop.f32.mrb[11].mxu0 }
0x14f7   :  { %v1025_v51 = vpop.permute.xlu0 %1024 }
0x14f8   :  { %v1027_v52 = vadd.f32 %v1025_v51, %v937_v43 }
0x14fa   :  { %2637 = vtanh.f32 %v1027_v52 }
0x1504   :  { %v2638_v58 = vpop.eup %2637 }
0x1505   :  { %1031 = vrot.lane.b32.xlu1 %v2638_v58, %s2770_s3 }
0x1509   :  { %1226 = vrot.lane.b32.xlu1 %v2154_v4, %s2769_s24 }
0x1577   :  { %v1032_v9 = vpop.permute.xlu1 %1031 }
0x1578   :  { %v1034_v6 = vmul.f32 %v1032_v9, %v1029_v3 }
0x157a   :  { %v1036_v7 = vadd.f32 %v1035_v5, %v1034_v6 }
0x157b   :  { %v3077_v10 = vpop.permute.xlu1 %1226 }
0x157c   :  { %1038 = vrot.lane.b32.xlu0 %v1036_v7, %s2770_s3  ;;  %v1229_v11 = vadd.f32 %v3077_v10, %v1210_v12 }
0x1580   :  { %1231 = vrot.lane.b32.xlu0 %v1229_v11, %s2769_s24 }
0x15ee   :  { %v1039_v13 = vpop.permute.xlu0 %1038 }
0x15ef   :  { %1041 = vst.msk [vmem:[#allocation2 + $0xe] sm:$0x3] %vm305_vm4, %v1039_v13 }
0x15f2   :  { %v1232_v26 = vpop.permute.xlu0 %1231 }
0x15f6   :  { %v1043_v14 = vld [vmem:[#allocation2 + $0x8] sm:$0xff] }
0x15f7   :  { %2372 = vmatmul.mubr.msk.f32.vlgmr.msra.gmra.mrb[8].mxu1 %vm192_vm5, %v1043_v14 }
0x15f8   :  { %2537 = vmatpush3.bf16.msra.mxu1 %v3040_v55  ;;  %2393 = vmatprep.mubr.msk.f32.mxu1 %vm2767_vm0, %v2768_v2 }
0x15f9   :  { %2538 = vmatprep.subr.bf16.mxu1 %v2766_v1 }
0x15fc   :  { %2540 = vmatpush3.bf16.msra.mxu1 %v3046_v57 }
0x15fd   :  { %2547 = vmatprep.subr.bf16.mxu1 %v2766_v1 }
0x16ca   :  { %v2373_v16 = vpop.f32.mrb[8].mxu1 }
0x16cb   :  { %v1133_v17 = vadd.f32 %v2373_v16, %v2150_v15  ;;  %v1127_v19 = vpop.f32.mrb[9].mxu1 }
0x16cc   :  { %v1128_v20 = vadd.f32 %v2150_v15, %v1127_v19 }
0x16cd   :  { %1137 = vst.msk [vmem:[#allocation4 + $0x8] sm:$0xff] %vm183_vm3, %v1133_v17 }
0x16ce   :  { %1136 = vst.msk [vmem:[#allocation4] sm:$0xff] %vm183_vm3, %v1128_v20 }
0x16d5   :  { %v1143_v21 = vld [vmem:[#allocation4] sm:$0x3]  ;;  %v1250_v41 = vld [vmem:[#allocation4 + $0x2] sm:$0x3]  ;;  %v1354_v62 = vld [vmem:[#allocation4 + $0x4] sm:$0x3] }
0x16d6   :  { %v1214_v22 = vadd.f32 %v1210_v12, %v1143_v21 }
0x16d8   :  { %v2153_v23 = vmul.f32 -1.442695, %v1214_v22  ;;  %v1458_v22 = vld [vmem:[#allocation4 + $0x6] sm:$0x3] }
0x16da   :  { %2639 = vpow2.f32 %v2153_v23 }
0x16e4   :  { %v2640_v24 = vpop.eup %2639 }
0x16e5   :  { %v1218_v25 = vadd.f32 1.0, %v2640_v24 }
0x16e7   :  { %2641 = vrcp.f32 %v1218_v25 }
0x16f1   :  { %v2642_v27 = vpop.eup %2641 }
0x16f2   :  { %v1234_v28 = vmul.f32 %v2642_v27, %v1232_v26  ;;  %v1241_v32 = vsub.f32 1.0, %v2642_v27  ;;  %v1247_v34 = vmul.f32 0.0, %v2642_v27 }
0x16f4   :  { %1236 = vrot.lane.b32.xlu1 %v1234_v28, %s2769_s24 }
0x1766   :  { %v1237_v29 = vpop.permute.xlu1 %1236 }
0x1767   :  { %v1239_v30 = vadd.f32 %v1237_v29, %v1143_v21 }
0x1769   :  { %2643 = vtanh.f32 %v1239_v30 }
0x1773   :  { %v2644_v31 = vpop.eup %2643 }
0x1774   :  { %1243 = vrot.lane.b32.xlu0 %v2644_v31, %s2770_s3 }
0x17e6   :  { %v1244_v33 = vpop.permute.xlu0 %1243 }
0x17e7   :  { %v1246_v35 = vmul.f32 %v1244_v33, %v1241_v32 }
0x17e9   :  { %v3096_v36 = vadd.f32 %v1247_v34, %v1246_v35 }
0x17eb   :  { %1252 = vrot.lane.b32.xlu1 %v3096_v36, %s2770_s3 }
0x185d   :  { %v1253_v37 = vpop.permute.xlu1 %1252 }
0x185e   :  { %2394 = vmatmul.mubr.msk.f32.vlgmr.msra.gmra.mrb[10].mxu1 %vm192_vm5, %v1253_v37 }
0x185f   :  { %2549 = vmatpush3.bf16.msra.mxu1 %v3040_v55  ;;  %2415 = vmatprep.mubr.msk.f32.mxu1 %vm2767_vm0, %v2768_v2 }
0x1860   :  { %2550 = vmatprep.subr.bf16.mxu1 %v2766_v1 }
0x1863   :  { %2552 = vmatpush3.bf16.msra.mxu1 %v3046_v57 }
0x1864   :  { %2559 = vmatprep.subr.bf16.mxu1 %v2766_v1 }
0x1931   :  { %v1322_v38 = vpop.f32.mrb[10].mxu1 }
0x1932   :  { %v1333_v39 = vadd.f32 %v1322_v38, %v3077_v10  ;;  %v2395_v40 = vpop.f32.mrb[11].mxu1  ;;  %v1326_v42 = vadd.f32 %v1322_v38, %v1250_v41 }
0x1934   :  { %1335 = vrot.lane.b32.xlu0 %v1333_v39, %s2769_s24  ;;  %v2156_v43 = vmul.f32 -1.442695, %v1326_v42 }
0x1936   :  { %2645 = vpow2.f32 %v2156_v43  ;;  %v1562_v43 = vld [vmem:[#allocation4 + $0x8] sm:$0x3] }
0x1940   :  { %v2646_v44 = vpop.eup %2645 }
0x1941   :  { %v1330_v45 = vadd.f32 1.0, %v2646_v44 }
0x1943   :  { %2647 = vrcp.f32 %v1330_v45 }
0x194d   :  { %v2648_v46 = vpop.eup %2647 }
0x194e   :  { %v1345_v52 = vsub.f32 1.0, %v2648_v46  ;;  %v1351_v53 = vmul.f32 %v2648_v46, %v3096_v36 }
0x19a6   :  { %v1336_v47 = vpop.permute.xlu0 %1335 }
0x19a7   :  { %v1338_v48 = vmul.f32 %v2648_v46, %v1336_v47 }
0x19a9   :  { %1340 = vrot.lane.b32.xlu1 %v1338_v48, %s2769_s24 }
0x1a1b   :  { %v1341_v49 = vpop.permute.xlu1 %1340 }
0x1a1c   :  { %v1343_v50 = vadd.f32 %v1341_v49, %v1250_v41 }
0x1a1e   :  { %2649 = vtanh.f32 %v1343_v50 }
0x1a28   :  { %v2650_v51 = vpop.eup %2649 }
0x1a29   :  { %1347 = vrot.lane.b32.xlu0 %v2650_v51, %s2770_s3 }
0x1a9b   :  { %v1348_v18 = vpop.permute.xlu0 %1347 }
0x1a9c   :  { %v1350_v54 = vmul.f32 %v1348_v18, %v1345_v52 }
0x1a9e   :  { %v3112_v56 = vadd.f32 %v1351_v53, %v1350_v54 }
0x1aa0   :  { %1356 = vrot.lane.b32.xlu1 %v3112_v56, %s2770_s3 }
0x1b12   :  { %v1357_v58 = vpop.permute.xlu1 %1356 }
0x1b13   :  { %2405 = vmatmul.mubr.msk.f32.vlgmr.msra.gmra.mrb[12].mxu0 %vm192_vm5, %v1357_v58 }
0x1b14   :  { %2555 = vmatpush3.bf16.msra.mxu0 %v3040_v55  ;;  %2426 = vmatprep.mubr.msk.f32.mxu0 %vm2767_vm0, %v2768_v2 }
0x1b15   :  { %2556 = vmatprep.subr.bf16.mxu0 %v2766_v1 }
0x1b18   :  { %2558 = vmatpush3.bf16.msra.mxu0 %v3046_v57 }
0x1b19   :  { %2565 = vmatprep.subr.bf16.mxu0 %v2766_v1 }
0x1be6   :  { %v1426_v59 = vpop.f32.mrb[12].mxu0 }
0x1be7   :  { %v1437_v60 = vadd.f32 %v1426_v59, %v3077_v10  ;;  %v2406_v61 = vpop.f32.mrb[13].mxu0  ;;  %v1430_v63 = vadd.f32 %v1426_v59, %v1354_v62 }
0x1be9   :  { %1439 = vrot.lane.b32.xlu0 %v1437_v60, %s2769_s24  ;;  %v2158_v0 = vmul.f32 -1.442695, %v1430_v63 }
0x1beb   :  { %2651 = vpow2.f32 %v2158_v0 }
0x1bf5   :  { %v2652_v3 = vpop.eup %2651 }
0x1bf6   :  { %v1434_v9 = vadd.f32 1.0, %v2652_v3  ;;  %v1666_v3 = vld [vmem:[#allocation4 + $0xa] sm:$0x3] }
0x1bf8   :  { %2653 = vrcp.f32 %v1434_v9 }
0x1c02   :  { %v2654_v4 = vpop.eup %2653 }
0x1c03   :  { %v1449_v11 = vsub.f32 1.0, %v2654_v4  ;;  %v1455_v14 = vmul.f32 %v2654_v4, %v3112_v56 }
0x1c5b   :  { %v1440_v5 = vpop.permute.xlu0 %1439 }
0x1c5c   :  { %v1442_v6 = vmul.f32 %v2654_v4, %v1440_v5 }
0x1c5e   :  { %1444 = vrot.lane.b32.xlu1 %v1442_v6, %s2769_s24 }
0x1cd0   :  { %v1445_v7 = vpop.permute.xlu1 %1444 }
0x1cd1   :  { %v1447_v12 = vadd.f32 %v1445_v7, %v1354_v62 }
0x1cd3   :  { %2655 = vtanh.f32 %v1447_v12 }
0x1cdd   :  { %v2656_v8 = vpop.eup %2655 }
0x1cde   :  { %1451 = vrot.lane.b32.xlu0 %v2656_v8, %s2770_s3 }
0x1d50   :  { %v1452_v13 = vpop.permute.xlu0 %1451 }
0x1d51   :  { %v1454_v15 = vmul.f32 %v1452_v13, %v1449_v11 }
0x1d53   :  { %v3128_v16 = vadd.f32 %v1455_v14, %v1454_v15 }
0x1d55   :  { %1460 = vrot.lane.b32.xlu1 %v3128_v16, %s2770_s3 }
0x1dc7   :  { %v1461_v17 = vpop.permute.xlu1 %1460 }
0x1dc8   :  { %2416 = vmatmul.mubr.msk.f32.vlgmr.msra.gmra.mrb[12].mxu1 %vm192_vm5, %v1461_v17 }
0x1dc9   :  { %2561 = vmatpush3.bf16.msra.mxu1 %v3040_v55  ;;  %2437 = vmatprep.mubr.msk.f32.mxu1 %vm2767_vm0, %v2768_v2 }
0x1dca   :  { %2562 = vmatprep.subr.bf16.mxu1 %v2766_v1 }
0x1dcd   :  { %2564 = vmatpush3.bf16.msra.mxu1 %v3046_v57 }
0x1dce   :  { %2571 = vmatprep.subr.bf16.mxu1 %v2766_v1 }
0x1e9b   :  { %v1530_v19 = vpop.f32.mrb[12].mxu1 }
0x1e9c   :  { %v1541_v20 = vadd.f32 %v1530_v19, %v3077_v10  ;;  %v2417_v21 = vpop.f32.mrb[13].mxu1  ;;  %v1534_v23 = vadd.f32 %v1530_v19, %v1458_v22 }
0x1e9e   :  { %1543 = vrot.lane.b32.xlu0 %v1541_v20, %s2769_s24  ;;  %v2160_v24 = vmul.f32 -1.442695, %v1534_v23 }
0x1ea0   :  { %2657 = vpow2.f32 %v2160_v24  ;;  %v1770_v24 = vld [vmem:[#allocation4 + $0xc] sm:$0x3] }
0x1eaa   :  { %v2658_v25 = vpop.eup %2657 }
0x1eab   :  { %v1538_v26 = vadd.f32 1.0, %v2658_v25 }
0x1ead   :  { %2659 = vrcp.f32 %v1538_v26 }
0x1eb7   :  { %v2660_v27 = vpop.eup %2659 }
0x1eb8   :  { %v1553_v33 = vsub.f32 1.0, %v2660_v27  ;;  %v1559_v35 = vmul.f32 %v2660_v27, %v3128_v16 }
0x1f10   :  { %v1544_v28 = vpop.permute.xlu0 %1543 }
0x1f11   :  { %v1546_v29 = vmul.f32 %v2660_v27, %v1544_v28 }
0x1f13   :  { %1548 = vrot.lane.b32.xlu1 %v1546_v29, %s2769_s24 }
0x1f85   :  { %v1549_v30 = vpop.permute.xlu1 %1548 }
0x1f86   :  { %v1551_v31 = vadd.f32 %v1549_v30, %v1458_v22 }
0x1f88   :  { %2661 = vtanh.f32 %v1551_v31 }
0x1f92   :  { %v2662_v32 = vpop.eup %2661 }
0x1f93   :  { %1555 = vrot.lane.b32.xlu0 %v2662_v32, %s2770_s3 }
0x2005   :  { %v1556_v34 = vpop.permute.xlu0 %1555 }
0x2006   :  { %v1558_v37 = vmul.f32 %v1556_v34, %v1553_v33 }
0x2008   :  { %v3144_v38 = vadd.f32 %v1559_v35, %v1558_v37 }
0x200a   :  { %1564 = vrot.lane.b32.xlu1 %v3144_v38, %s2770_s3 }
0x207c   :  { %v1565_v39 = vpop.permute.xlu1 %1564 }
0x207d   :  { %2427 = vmatmul.mubr.msk.f32.vlgmr.msra.gmra.mrb[14].mxu0 %vm192_vm5, %v1565_v39 }
0x207e   :  { %2567 = vmatpush3.bf16.msra.mxu0 %v3040_v55  ;;  %2448 = vmatprep.mubr.msk.f32.mxu0 %vm2767_vm0, %v2768_v2 }
0x207f   :  { %2568 = vmatprep.subr.bf16.mxu0 %v2766_v1 }
0x2082   :  { %2570 = vmatpush3.bf16.msra.mxu0 %v3046_v57 }
0x2083   :  { %2577 = vmatprep.subr.bf16.mxu0 %v2766_v1 }
0x2150   :  { %v1634_v40 = vpop.f32.mrb[14].mxu0 }
0x2151   :  { %v1645_v41 = vadd.f32 %v1634_v40, %v3077_v10  ;;  %v2428_v42 = vpop.f32.mrb[15].mxu0  ;;  %v1638_v44 = vadd.f32 %v1634_v40, %v1562_v43 }
0x2153   :  { %1647 = vrot.lane.b32.xlu0 %v1645_v41, %s2769_s24  ;;  %v2162_v45 = vmul.f32 -1.442695, %v1638_v44 }
0x2155   :  { %2663 = vpow2.f32 %v2162_v45  ;;  %v1874_v45 = vld [vmem:[#allocation4 + $0xe] sm:$0x3] }
0x215f   :  { %v2664_v46 = vpop.eup %2663 }
0x2160   :  { %v1642_v47 = vadd.f32 1.0, %v2664_v46 }
0x2162   :  { %2665 = vrcp.f32 %v1642_v47 }
0x216c   :  { %v2666_v48 = vpop.eup %2665 }
0x216d   :  { %v1657_v53 = vsub.f32 1.0, %v2666_v48  ;;  %v1663_v58 = vmul.f32 %v2666_v48, %v3144_v38 }
0x21c5   :  { %v1648_v49 = vpop.permute.xlu0 %1647 }
0x21c6   :  { %v1650_v50 = vmul.f32 %v2666_v48, %v1648_v49 }
0x21c8   :  { %1652 = vrot.lane.b32.xlu1 %v1650_v50, %s2769_s24 }
0x223a   :  { %v1653_v51 = vpop.permute.xlu1 %1652 }
0x223b   :  { %v1655_v52 = vadd.f32 %v1653_v51, %v1562_v43 }
0x223d   :  { %2667 = vtanh.f32 %v1655_v52 }
0x2247   :  { %v2668_v18 = vpop.eup %2667 }
0x2248   :  { %1659 = vrot.lane.b32.xlu0 %v2668_v18, %s2770_s3 }
0x22ba   :  { %v1660_v54 = vpop.permute.xlu0 %1659 }
0x22bb   :  { %v1662_v59 = vmul.f32 %v1660_v54, %v1657_v53  ;;  %v1980_v54 = vld [vmem:[%s3232_s9 + $0x8] sm:$0xff] }
0x22bd   :  { %v3160_v60 = vadd.f32 %v1663_v58, %v1662_v59  ;;  %v1981_v58 = vld [vmem:[%s3232_s9 + $0x10] sm:$0xff] }
0x22bf   :  { %1668 = vrot.lane.b32.xlu1 %v3160_v60, %s2770_s3 }
0x2331   :  { %v1669_v61 = vpop.permute.xlu1 %1668 }
0x2332   :  { %2438 = vmatmul.mubr.msk.f32.vlgmr.msra.gmra.mrb[14].mxu1 %vm192_vm5, %v1669_v61  ;;  %v1982_v61 = vld [vmem:[%s3232_s9 + $0x18] sm:$0xff] }
0x2333   :  { %2573 = vmatpush3.bf16.msra.mxu1 %v3040_v55  ;;  %2459 = vmatprep.mubr.msk.f32.mxu1 %vm2767_vm0, %v2768_v2 }
0x2334   :  { %2574 = vmatprep.subr.bf16.mxu1 %v2766_v1 }
0x2337   :  { %2576 = vmatpush3.bf16.msra.mxu1 %v3046_v57 }
0x2405   :  { %v1738_v62 = vpop.f32.mrb[14].mxu1 }
0x2406   :  { %v1749_v63 = vadd.f32 %v1738_v62, %v3077_v10  ;;  %v2439_v0 = vpop.f32.mrb[15].mxu1  ;;  %v1742_v9 = vadd.f32 %v1738_v62, %v1666_v3  ;;  %v2581_v62 = vpack.c.bf16 %v1982_v61, %v1981_v58 }
0x2407   :  { %v1353_v0 = vadd.f32 %v3112_v56, %v3096_v36  ;;  %v2169_v36 = vld [vmem:[%s3233_s10] ss:$0 sm:$0xff] }
0x2408   :  { %1751 = vrot.lane.b32.xlu0 %v1749_v63, %s2769_s24  ;;  %v2164_v4 = vmul.f32 -1.442695, %v1742_v9 }
0x240a   :  { %2669 = vpow2.f32 %v2164_v4 }
0x2414   :  { %v2670_v5 = vpop.eup %2669 }
0x2415   :  { %v1746_v6 = vadd.f32 1.0, %v2670_v5 }
0x2417   :  { %2671 = vrcp.f32 %v1746_v6 }
0x2421   :  { %v2672_v55 = vpop.eup %2671 }
0x2422   :  { %v1761_v13 = vsub.f32 1.0, %v2672_v55  ;;  %v1767_v15 = vmul.f32 %v2672_v55, %v3160_v60 }
0x247a   :  { %v1752_v7 = vpop.permute.xlu0 %1751 }
0x247b   :  { %v1754_v12 = vmul.f32 %v2672_v55, %v1752_v7 }
0x247d   :  { %1756 = vrot.lane.b32.xlu1 %v1754_v12, %s2769_s24 }
0x24ef   :  { %v1757_v8 = vpop.permute.xlu1 %1756 }
0x24f0   :  { %v1759_v57 = vadd.f32 %v1757_v8, %v1666_v3  ;;  %v1457_v3 = vadd.f32 %v3128_v16, %v1353_v0 }
0x24f2   :  { %2673 = vtanh.f32 %v1759_v57  ;;  %v1561_v9 = vadd.f32 %v3144_v38, %v1457_v3 }
0x24f4   :  { %v1665_v4 = vadd.f32 %v3160_v60, %v1561_v9 }
0x24fc   :  { %v2674_v11 = vpop.eup %2673 }
0x24fd   :  { %1763 = vrot.lane.b32.xlu0 %v2674_v11, %s2770_s3 }
0x256f   :  { %v1764_v14 = vpop.permute.xlu0 %1763 }
0x2570   :  { %v1766_v17 = vmul.f32 %v1764_v14, %v1761_v13 }
0x2572   :  { %v3175_v19 = vadd.f32 %v1767_v15, %v1766_v17 }
0x2574   :  { %1772 = vrot.lane.b32.xlu1 %v3175_v19, %s2770_s3  ;;  %v1769_v55 = vadd.f32 %v3175_v19, %v1665_v4 }
0x25e6   :  { %v1773_v20 = vpop.permute.xlu1 %1772 }
0x25e7   :  { %2449 = vmatmul.mubr.msk.f32.vlgmr.msra.gmra.mrb[16].mxu0 %vm192_vm5, %v1773_v20 }
0x25e8   :  { %2470 = vmatprep.mubr.msk.f32.mxu0 %vm2767_vm0, %v2768_v2 }
0x26ba   :  { %v1842_v21 = vpop.f32.mrb[16].mxu0 }
0x26bb   :  { %v1853_v22 = vadd.f32 %v1842_v21, %v3077_v10  ;;  %v2450_v23 = vpop.f32.mrb[17].mxu0  ;;  %v1846_v25 = vadd.f32 %v1842_v21, %v1770_v24 }
0x26bd   :  { %1855 = vrot.lane.b32.xlu0 %v1853_v22, %s2769_s24  ;;  %v2166_v26 = vmul.f32 -1.442695, %v1846_v25  ;;  %v2171_v25 = vld [vmem:[#allocation6] ss:$0 sm:$0xff] }
0x26bf   :  { %2675 = vpow2.f32 %v2166_v26 }
0x26c9   :  { %v2676_v27 = vpop.eup %2675 }
0x26ca   :  { %v1850_v28 = vadd.f32 1.0, %v2676_v27  ;;  %v2172_v27 = vld [vmem:[#allocation8] ss:$0 sm:$0xff] }
0x26cc   :  { %2677 = vrcp.f32 %v1850_v28 }
0x26d6   :  { %v2678_v29 = vpop.eup %2677 }
0x26d7   :  { %v1865_v34 = vsub.f32 1.0, %v2678_v29  ;;  %v1871_v37 = vmul.f32 %v2678_v29, %v3175_v19 }
0x272f   :  { %v1856_v30 = vpop.permute.xlu0 %1855 }
0x2730   :  { %v1858_v31 = vmul.f32 %v2678_v29, %v1856_v30  ;;  %v2173_v30 = vld [vmem:[#allocation10] ss:$0 sm:$0xff] }
0x2732   :  { %1860 = vrot.lane.b32.xlu1 %v1858_v31, %s2769_s24 }
0x27a4   :  { %v1861_v32 = vpop.permute.xlu1 %1860 }
0x27a5   :  { %v1863_v2 = vadd.f32 %v1861_v32, %v1770_v24 }
0x27a7   :  { %2679 = vtanh.f32 %v1863_v2 }
0x27b1   :  { %v2680_v33 = vpop.eup %2679 }
0x27b2   :  { %1867 = vrot.lane.b32.xlu0 %v2680_v33, %s2770_s3  ;;  %v2174_v33 = vld [vmem:[#allocation5] ss:$0 sm:$0xff] }
0x2824   :  { %v1868_v35 = vpop.permute.xlu0 %1867 }
0x2825   :  { %v1870_v39 = vmul.f32 %v1868_v35, %v1865_v34 }
0x2827   :  { %v1872_v40 = vadd.f32 %v1871_v37, %v1870_v39 }
0x2829   :  { %1876 = vrot.lane.b32.xlu1 %v1872_v40, %s2770_s3 }
0x289b   :  { %v1877_v41 = vpop.permute.xlu1 %1876 }
0x289c   :  { %2460 = vmatmul.mubr.msk.f32.vlgmr.msra.gmra.mrb[16].mxu1 %vm192_vm5, %v1877_v41 }
0x296f   :  { %v1946_v42 = vpop.f32.mrb[16].mxu1 }
0x2970   :  { %v1957_v43 = vadd.f32 %v1946_v42, %v3077_v10  ;;  %v2461_v44 = vpop.f32.mrb[17].mxu1  ;;  %v1950_v46 = vadd.f32 %v1946_v42, %v1874_v45  ;;  %v1979_v10 = vld [vmem:[%s3232_s9] sm:$0xff] }
0x2971   :  { %v2578_v59 = vpack.c.bf16 %v1980_v54, %v1979_v10 }
0x2972   :  { %1959 = vrot.lane.b32.xlu0 %v1957_v43, %s2769_s24  ;;  %v2168_v47 = vmul.f32 -1.442695, %v1950_v46 }
0x2973   :  { %2579 = vmatpush3.bf16.msra.mxu0 %v2578_v59 }
0x2974   :  { %2681 = vpow2.f32 %v2168_v47  ;;  %2580 = vmatprep.subr.bf16.mxu0 %v2766_v1  ;;  %v1873_v1 = vadd.f32 %v1872_v40, %v1769_v55 }
0x2977   :  { %2582 = vmatpush3.bf16.msra.mxu0 %v2581_v62 }
0x297e   :  { %v2682_v48 = vpop.eup %2681 }
0x297f   :  { %v1954_v49 = vadd.f32 1.0, %v2682_v48 }
0x2981   :  { %2683 = vrcp.f32 %v1954_v49 }
0x298b   :  { %v2684_v50 = vpop.eup %2683 }
0x298c   :  { %v1969_v5 = vsub.f32 1.0, %v2684_v50  ;;  %v1975_v7 = vmul.f32 %v2684_v50, %v1872_v40 }
0x29e4   :  { %v1960_v51 = vpop.permute.xlu0 %1959 }
0x29e5   :  { %v1962_v52 = vmul.f32 %v2684_v50, %v1960_v51 }
0x29e7   :  { %1964 = vrot.lane.b32.xlu1 %v1962_v52, %s2769_s24 }
0x2a59   :  { %v1965_v18 = vpop.permute.xlu1 %1964 }
0x2a5a   :  { %v1967_v53 = vadd.f32 %v1965_v18, %v1874_v45 }
0x2a5c   :  { %2685 = vtanh.f32 %v1967_v53 }
0x2a66   :  { %v2686_v63 = vpop.eup %2685 }
0x2a67   :  { %1971 = vrot.lane.b32.xlu0 %v2686_v63, %s2770_s3 }
0x2ad9   :  { %v1972_v6 = vpop.permute.xlu0 %1971 }
0x2ada   :  { %v1974_v12 = vmul.f32 %v1972_v6, %v1969_v5 }
0x2adc   :  { %v1976_v8 = vadd.f32 %v1975_v7, %v1974_v12 }
0x2ade   :  { %v1977_v57 = vadd.f32 %v1976_v8, %v1873_v1 }
0x2ae0   :  { %v1978_v11 = vmul.f32 0.125, %v1977_v57 }
0x2ae2   :  { %1991 = vrot.lane.b32.xlu1 %v1978_v11, %s2770_s3 }
0x2b54   :  { %v1992_v13 = vpop.permute.xlu1 %1991 }
0x2b55   :  { %2471 = vmatmul.mubr.msk.f32.vlgmr.msra.gmra.mrb[18].mxu0 %vm192_vm5, %v1992_v13 }
0x2c28   :  { %v2061_v56 = vpop.f32.mrb[18].mxu0 }
0x2c29   :  { %v2062_v16 = vadd.f32 %v2169_v36, %v2061_v56  ;;  %v2472_v38 = vpop.f32.mrb[19].mxu0 }
0x2c2b   :  { %v2066_v60 = vsel %vm2065_vm6, %v2062_v16, 0.0 }
0x2c2c   :  { %2067 = vadd.xlane.f32.xlu0 %v2066_v60 }
0x2cb9   :  { %v2068_v14 = vpop.xlane.xlu0 %2067 }
0x2cba   :  { %v2070_v15 = vmul.f32 0.015625, %v2068_v14 }
0x2cbc   :  { %v2071_v17 = vsub.f32 %v2062_v16, %v2070_v15 }
0x2cbe   :  { %v2072_v19 = vmul.f32 %v2071_v17, %v2071_v17 }
0x2cc0   :  { %v2073_v20 = vsel %vm2065_vm6, %v2072_v19, 0.0 }
0x2cc1   :  { %2074 = vadd.xlane.f32.xlu1 %v2073_v20 }
0x2d4e   :  { %v2075_v21 = vpop.xlane.xlu1 %2074 }
0x2d4f   :  { %v2076_v22 = vmul.f32 0.015625, %v2075_v21 }
0x2d51   :  { %v2077_v23 = vadd.f32 1e-05, %v2076_v22 }
0x2d53   :  { %2687 = vrsqrt.f32 %v2077_v23 }
0x2d5d   :  { %v2688_v24 = vpop.eup %2687 }
0x2d5e   :  { %v2079_v26 = vmul.f32 %v2688_v24, %v2071_v17 }
0x2d60   :  { %v2087_v28 = vmul.f32 %v2171_v25, %v2079_v26 }
0x2d62   :  { %v2095_v29 = vadd.f32 %v2172_v27, %v2087_v28 }
0x2d64   :  { %v2096_v31 = vmax.f32 %v2095_v29, 0.0 }
0x2d66   :  { %v2104_v32 = vmul.f32 %v2173_v30, %v2096_v31 }
0x2d68   :  { %v2105_v2 = vsel %vm2065_vm6, %v2104_v32, 0.0 }
0x2d69   :  { %2106 = vadd.xlane.f32.xlu0 %v2105_v2 }
0x2df6   :  { %v2107_v34 = vpop.xlane.xlu0 %2106 }
0x2df7   :  { %v2115_v35 = vadd.f32 %v2174_v33, %v2107_v34 }
0x2df9   :  { %v2175_v37 = vmul.f32 -1.442695, %v2115_v35 }
0x2dfb   :  { %2689 = vpow2.f32 %v2175_v37 }
0x2e05   :  { %v2690_v39 = vpop.eup %2689 }
0x2e06   :  { %v2119_v40 = vadd.f32 1.0, %v2690_v39 }
0x2e08   :  { %2691 = vrcp.f32 %v2119_v40 }
0x2e12   :  { %v2692_v41 = vpop.eup %2691 }
0x2e13   :  { %2123 = vst.msk [vmem:[%s3238_s15] sm:$0x3] %vm2122_vm7, %v2692_v41 }
0x2e14   :  { %2128 = vsyncpa [#allocation7], 1 }
0x2e15   :  { %2129 = vsyncpa [#allocation9], 1 }

</bundles_post_ra>
